<compile_context>
chip_gen: v5e
topology: v5e:2x2
jax: 0.10.0
libtpu: 0.0.40
codegen_flags: <defaults>
</compile_context>

<pallas_src>
import jax
import jax.numpy as jnp
from jax.experimental import pallas as pl
from jax.experimental.pallas import tpu as pltpu


def _round_up(v, m):
    return (v + m - 1) // m * m


def residual_layer_kernel(x_ref, w1_ref, b1_ref, w2_ref, b2_ref, o_ref):
    # x_ref:  [TILE_N, Hp] (input dtype)          resident per-tile
    # w1_ref, w2_ref: [Hp, Hp] bf16 (pre-transposed)   resident across grid
    # b1_ref, b2_ref: [1, Hp]  f32                     resident across grid
    x = x_ref[...]

    # lin1 + swish   (bf16 MXU operands, f32 accumulate / elementwise)
    h = jnp.dot(x.astype(jnp.bfloat16), w1_ref[...],
                preferred_element_type=jnp.float32) + b1_ref[...]
    h = h * jax.nn.sigmoid(h)

    # lin2 + swish
    h = jnp.dot(h.astype(jnp.bfloat16), w2_ref[...],
                preferred_element_type=jnp.float32) + b2_ref[...]
    h = h * jax.nn.sigmoid(h)

    # residual add in f32
    o_ref[...] = (x.astype(jnp.float32) + h).astype(o_ref.dtype)


def residual_layer(x, w1, b1, w2, b2, *, tile_n=256, donate_x=False):
    """DimeNet ResidualLayer forward.

    x: [N, H]; w1, w2: torch-Linear weights of shape [H_out, H_in]; b1, b2: [H].
    If donate_x=True the (possibly padded) x buffer is aliased to the output;
    the caller must not reuse x afterwards.
    """
    n, h = x.shape
    out_dtype = x.dtype

    hp = _round_up(max(h, 128), 128)          # lane-dense hidden dim
    tile_n = min(tile_n, _round_up(n, 8))     # sublane-aligned row tile
    n_pad = _round_up(n, tile_n)
    grid = (pl.cdiv(n_pad, tile_n),)

    # --- pad / pre-transpose parameters (exact-zero padding, see header) ---
    x_p = x
    if (n_pad, hp) != (n, h):
        x_p = jnp.zeros((n_pad, hp), x.dtype).at[:n, :h].set(x)

    def prep_w(w):  # [H_out, H_in] torch layout -> [Hp_in, Hp_out] bf16
        wt = jnp.zeros((hp, hp), jnp.float32).at[:h, :h].set(
            w.T.astype(jnp.float32))
        return wt.astype(jnp.bfloat16)

    def prep_b(b):  # [H] -> [1, Hp] f32
        return jnp.zeros((1, hp), jnp.float32).at[0, :h].set(
            b.astype(jnp.float32))

    row_spec = pl.BlockSpec((tile_n, hp), lambda i: (i, 0))
    w_spec = pl.BlockSpec((hp, hp), lambda i: (0, 0))      # resident weights
    b_spec = pl.BlockSpec((1, hp), lambda i: (0, 0))       # resident biases

    io_aliases = {0: 0} if donate_x else {}

    out = pl.pallas_call(
        residual_layer_kernel,
        out_shape=jax.ShapeDtypeStruct((n_pad, hp), out_dtype),
        grid=grid,
        in_specs=[row_spec, w_spec, b_spec, w_spec, b_spec],
        out_specs=row_spec,
        input_output_aliases=io_aliases,
        compiler_params=pltpu.CompilerParams(
            dimension_semantics=("parallel",)),
    )(x_p, prep_w(w1), prep_b(b1), prep_w(w2), prep_b(b2))

    if (n_pad, hp) != (n, h):
        out = out[:n, :h]
    return out


# ----------------------------- test harness --------------------------------

def _swish(z):
    return z * jax.nn.sigmoid(z)


def glorot_orthogonal(key, shape, scale=2.0):
    """Deterministic glorot_orthogonal-style init (orthogonal matrix rescaled
    so that Var(W) = scale / (fan_in + fan_out)), matching the PyTorch helper's
    intent."""
    out_f, in_f = shape
    a = jax.random.normal(key, (max(shape), min(shape)), dtype=jnp.float32)
    q, _ = jnp.linalg.qr(a)
    w = q[:out_f, :in_f] if out_f >= in_f else q[:in_f, :out_f].T
    var = jnp.var(w)
    return w * jnp.sqrt(scale / ((in_f + out_f) * var))


def reference(x, w1, b1, w2, b2):
    h = _swish(x @ w1.T + b1)
    h = _swish(h @ w2.T + b2)
    return x + h


def _run_case(key, n, h):
    kx, k1, k2, kb1, kb2 = jax.random.split(key, 5)
    x = jax.random.normal(kx, (n, h), dtype=jnp.float32)
    w1 = glorot_orthogonal(k1, (h, h), scale=2.0)
    w2 = glorot_orthogonal(k2, (h, h), scale=2.0)
    # Module inits biases to 0; use small nonzero biases to exercise the path.
    b1 = 0.1 * jax.random.normal(kb1, (h,), dtype=jnp.float32)
    b2 = 0.1 * jax.random.normal(kb2, (h,), dtype=jnp.float32)

    out = jax.block_until_ready(residual_layer(x, w1, b1, w2, b2))
    ref = reference(x, w1, b1, w2, b2)

    assert out.shape == (n, h)
    # bf16 MXU operands with f32 accumulation -> loosen tolerance vs full-f32.
    assert jnp.allclose(out, ref, atol=2e-2, rtol=2e-2), (
        f"mismatch for shape ({n},{h}): "
        f"max abs err {float(jnp.max(jnp.abs(out - ref)))}")


if __name__ == "__main__":
    key = jax.random.PRNGKey(0)
    k_main, k_small = jax.random.split(key)

    # Main case: DimeNet-default hidden_channels=128, many rows -> row grid of
    # 4 tiles, resident weights, lane-dense (no padding needed).
    _run_case(k_main, n=1024, h=128)

    # Small / ragged case: exercises the exact zero-padding path (H=32 -> 128
    # lanes, N=10 -> 16 rows).
    _run_case(k_small, n=10, h=32)

    print("KERNEL_OK")
</pallas_src>

<mosaic_0001>
module attributes {stable_mosaic.version = 11 : i64} {
  func.func @residual_layer_kernel(%arg0: i32, %arg1: memref<256x128xf32, #tpu.memory_space<vmem>>, %arg2: memref<128x128xbf16, #tpu.memory_space<vmem>>, %arg3: memref<1x128xf32, #tpu.memory_space<vmem>>, %arg4: memref<128x128xbf16, #tpu.memory_space<vmem>>, %arg5: memref<1x128xf32, #tpu.memory_space<vmem>>, %arg6: memref<256x128xf32, #tpu.memory_space<vmem>>) attributes {dimension_semantics = [#tpu.dimension_semantics<parallel>], iteration_bounds = array<i64: 4>, scalar_prefetch = 0 : i64, scratch_operands = 0 : i64, tpu.core_type = #tpu.core_type<tc>, window_params = [{transform_indices = @transform_0, window_bounds = array<i64: 256, 128>}, {pipeline_mode = #tpu.pipeline_mode<synchronous>, transform_indices = @transform_1, window_bounds = array<i64: 128, 128>}, {pipeline_mode = #tpu.pipeline_mode<synchronous>, transform_indices = @transform_2, window_bounds = array<i64: 1, 128>}, {pipeline_mode = #tpu.pipeline_mode<synchronous>, transform_indices = @transform_3, window_bounds = array<i64: 128, 128>}, {pipeline_mode = #tpu.pipeline_mode<synchronous>, transform_indices = @transform_4, window_bounds = array<i64: 1, 128>}, {transform_indices = @transform_5, window_bounds = array<i64: 256, 128>}]} {
    %c0 = arith.constant 0 : index
    %c0_0 = arith.constant 0 : index
    %0 = vector.load %arg1[%c0, %c0_0] : memref<256x128xf32, #tpu.memory_space<vmem>>, vector<256x128xf32>
    %1 = arith.truncf %0 : vector<256x128xf32> to vector<256x128xbf16>
    %c0_1 = arith.constant 0 : index
    %c0_2 = arith.constant 0 : index
    %2 = vector.load %arg2[%c0_1, %c0_2] : memref<128x128xbf16, #tpu.memory_space<vmem>>, vector<128x128xbf16>
    %cst = arith.constant dense<0.000000e+00> : vector<256x128xf32>
    %3 = tpu.matmul %1, %2, %cst {dimension_numbers = #tpu.dot_dimension_numbers<[1], [0], [0], [1], [0, 0, 1, 1], [], []>} : vector<256x128xbf16>, vector<128x128xbf16>, vector<256x128xf32> -> vector<256x128xf32>
    %c0_3 = arith.constant 0 : index
    %c0_4 = arith.constant 0 : index
    %4 = vector.load %arg3[%c0_3, %c0_4] : memref<1x128xf32, #tpu.memory_space<vmem>>, vector<1x128xf32>
    %5 = vector.broadcast %4 : vector<1x128xf32> to vector<256x128xf32>
    %6 = arith.addf %3, %5 : vector<256x128xf32>
    %7 = arith.negf %6 : vector<256x128xf32>
    %8 = math.exp %7 : vector<256x128xf32>
    %cst_5 = arith.constant 1.000000e+00 : f32
    %9 = vector.broadcast %cst_5 : f32 to vector<256x128xf32>
    %10 = arith.addf %9, %8 : vector<256x128xf32>
    %11 = arith.divf %9, %10 : vector<256x128xf32>
    %12 = arith.mulf %6, %11 : vector<256x128xf32>
    %13 = arith.truncf %12 : vector<256x128xf32> to vector<256x128xbf16>
    %c0_6 = arith.constant 0 : index
    %c0_7 = arith.constant 0 : index
    %14 = vector.load %arg4[%c0_6, %c0_7] : memref<128x128xbf16, #tpu.memory_space<vmem>>, vector<128x128xbf16>
    %cst_8 = arith.constant dense<0.000000e+00> : vector<256x128xf32>
    %15 = tpu.matmul %13, %14, %cst_8 {dimension_numbers = #tpu.dot_dimension_numbers<[1], [0], [0], [1], [0, 0, 1, 1], [], []>} : vector<256x128xbf16>, vector<128x128xbf16>, vector<256x128xf32> -> vector<256x128xf32>
    %c0_9 = arith.constant 0 : index
    %c0_10 = arith.constant 0 : index
    %16 = vector.load %arg5[%c0_9, %c0_10] : memref<1x128xf32, #tpu.memory_space<vmem>>, vector<1x128xf32>
    %17 = vector.broadcast %16 : vector<1x128xf32> to vector<256x128xf32>
    %18 = arith.addf %15, %17 : vector<256x128xf32>
    %19 = arith.negf %18 : vector<256x128xf32>
    %20 = math.exp %19 : vector<256x128xf32>
    %cst_11 = arith.constant 1.000000e+00 : f32
    %21 = vector.broadcast %cst_11 : f32 to vector<256x128xf32>
    %22 = arith.addf %21, %20 : vector<256x128xf32>
    %23 = arith.divf %21, %22 : vector<256x128xf32>
    %24 = arith.mulf %18, %23 : vector<256x128xf32>
    %25 = arith.addf %0, %24 : vector<256x128xf32>
    %c0_12 = arith.constant 0 : index
    %c0_13 = arith.constant 0 : index
    %26 = vector.load %arg6[%c0_12, %c0_13] : memref<256x128xf32, #tpu.memory_space<vmem>>, vector<256x128xf32>
    tpu.vector_store %arg6[%c0_12, %c0_13], %25 {strides = array<i32>} : memref<256x128xf32, #tpu.memory_space<vmem>>, vector<256x128xf32>,
    return
  }
  func.func @transform_0(%arg0: i32) -> (i32, i32) {
    %c0_i32 = arith.constant 0 : i32
    %c0_i32_0 = arith.constant 0 : i32
    return %arg0, %c0_i32 : i32, i32
  }
  func.func @transform_1(%arg0: i32) -> (i32, i32) {
    %c0_i32 = arith.constant 0 : i32
    %c0_i32_0 = arith.constant 0 : i32
    %c0_i32_1 = arith.constant 0 : i32
    return %c0_i32, %c0_i32_0 : i32, i32
  }
  func.func @transform_2(%arg0: i32) -> (i32, i32) {
    %c0_i32 = arith.constant 0 : i32
    %c0_i32_0 = arith.constant 0 : i32
    %c0_i32_1 = arith.constant 0 : i32
    return %c0_i32, %c0_i32_0 : i32, i32
  }
  func.func @transform_3(%arg0: i32) -> (i32, i32) {
    %c0_i32 = arith.constant 0 : i32
    %c0_i32_0 = arith.constant 0 : i32
    %c0_i32_1 = arith.constant 0 : i32
    return %c0_i32, %c0_i32_0 : i32, i32
  }
  func.func @transform_4(%arg0: i32) -> (i32, i32) {
    %c0_i32 = arith.constant 0 : i32
    %c0_i32_0 = arith.constant 0 : i32
    %c0_i32_1 = arith.constant 0 : i32
    return %c0_i32, %c0_i32_0 : i32, i32
  }
  func.func @transform_5(%arg0: i32) -> (i32, i32) {
    %c0_i32 = arith.constant 0 : i32
    %c0_i32_0 = arith.constant 0 : i32
    return %arg0, %c0_i32 : i32, i32
  }
}

</mosaic_0001>

<bundles_post_ra>
// kernel: tpu_custom_call.1
= control target key start
LH: loop header
LB: loop body
LE: loop exit
PB: predicated region body
PF: predicated region fallthrough
CT: control target
= control target key end

     0   :  { %10 = vsyncpa [#allocation3], 0  ;;  %s4530_s0 = inlined_call_operand.hbm [shape: f32[1024,128], index: 0, kind: input, shape index: {}]   ;;  %s4531_s1 = inlined_call_operand.hbm [shape: bf16[128,128], index: 1, kind: input, shape index: {}]   ;;  %s4532_s2 = inlined_call_operand.vmem [shape: f32[1,128], index: 2, kind: input, shape index: {}]   ;;  %s4533_s3 = inlined_call_operand.hbm [shape: bf16[128,128], index: 3, kind: input, shape index: {}]   ;;  %s4534_s4 = inlined_call_operand.vmem [shape: f32[1,128], index: 4, kind: input, shape index: {}]   ;;  %s4535_s5 = inlined_call_operand.hbm [shape: f32[1024,128], index: 5, kind: output, shape index: {}]  }
   0x1   :  { %12 = vsyncpa [#allocation3 + $0x1], 0 }
   0x2   :  { %13 = vsyncpa [#allocation6], 0 }
   0x3   :  { %14 = vsyncpa [#allocation4], 0 }
   0x4   :  { %16 = vsyncpa [#allocation4 + $0x1], 0  ;;  %s2855_s18 = smov 0   ;;  %s2857_s19 = smov 0  }
   0x5   :  { %s2859_s20 = smov 0   ;;  %s2861_s21 = smov 0  }
   0x6 LB: > { %s2876_s22 = sadd.s32 4294967295, %s2815_s21   ;;  %s2110_s23 = sadd.s32 4294967294, %s2815_s21   ;;  %s2815_s21 = sphi %s2861_s21, %s4666_s21   ;;  %s2811_s20 = sphi %s2859_s20, %s4665_s20   ;;  %s2807_s19 = sphi %s2857_s19, %s4664_s19   ;;  %s2803_s18 = sphi %s2855_s18, %s4663_s18  }
   0x7   : > { %p42_p0 = scmp.ne.s32.totalorder %s2807_s19, %s2803_s18  ;;  %p43_p1 = scmp.eq.s32.totalorder %s2876_s22, 0 }
   0x8   : > { %p150_p2 = scmp.eq.s32.totalorder %s2876_s22, 3  ;;  %p156_p3 = scmp.eq.s32.totalorder %s2110_s23, 3 }
   0x9   : > { %p2885_p4 = por %p43_p1, %p42_p0  ;;  %p2111_p5 = scmp.ge.s32.totalorder %s2815_s21, 1 }
   0xa   : > { %p2890_p6 = por %p156_p3, %p42_p0  ;;  %p163_p7 = scmp.lt.s32.totalorder %s2815_s21, 5 }
   0xb   : > { %s174_s28 = sshll.u32 %s4531_s1, 4  ;;  %s2817_s30 = smov [#allocation5]   ;;  %s175_s28 = int_to_ptr.hbm [resolvable:$true] %s174_s28 }
   0xc   : > { %p2898_p8 = pnand %p2111_p5, %p163_p7  ;;  %s176_s6 = sshll.u32 %s2817_s30, 4  ;;  %s177_s6 = int_to_ptr.vmem [resolvable:$true] %s176_s6 }
   0xd   : > { %s191_s9 = sshll.u32 %s4533_s3, 4  ;;  %s2818_s10 = smov 64   ;;  %s192_s9 = int_to_ptr.hbm [resolvable:$true] %s191_s9 }
   0xe   : > { %p2302_p9 = pneg %p2898_p8  ;;  %s2819_s11 = smov 4  }
   0xf   : > { %s2820_s12 = smov [#allocation7]   ;;  %s2910_s14 = sadd.s32 1, %s2815_s21  }
  0x10   : > { %p2303_p10 = pnand %p2302_p9, %p43_p1  ;;  %s193_s13 = sshll.u32 %s2820_s12, 4  ;;  %s194_s13 = int_to_ptr.vmem [resolvable:$true] %s193_s13 }
  0x11   : > { %s29_s15 = sadd.s32 1, %s2811_s20  ;;  %s26_s16 = ssub.s32 %s2815_s21, %s2910_s14 }
  0x12   : > { %2305 = dma.hbm_to_vmem [thread:$0]  (!%p2303_p10), %s175_s28, 1024, %s177_s6, [#allocation6], %s2818_s10, %s2818_s10, %s2819_s11  }
  0x13   : > { %2308 = dma.hbm_to_vmem [thread:$0]  (!%p2303_p10), %s192_s9, 1024, %s194_s13, [#allocation6], %s2818_s10, %s2818_s10, %s2819_s11  }
  0x14   : > { %p36_p11 = scmp.ne.s32.totalorder %s2811_s20, %s2807_s19  ;;  %p27_p12 = scmp.eq.s32.totalorder %s26_s16, 0 }
  0x15   : > { %p37_p13 = scmp.eq.s32.totalorder %s2815_s21, 0  ;;  %p2319_p3 = scmp.lt.s32.totalorder %s2815_s21, 4 }
  0x16   : > { %p2920_p0 = por %p150_p2, %p36_p11  ;;  %s210_s26 = sand.u32 1, %s2811_s20  }
  0x17   : > { %s2926_s23 = scalar_select %p27_p12, %s2811_s20, %s29_s15  }
  0x18   : > { %p38_p5 = por %p37_p13, %p36_p11  ;;  %s2115_s27 = sshll.u32 %s210_s26, 8 }
  0x19   : > { %s2256_s28 = sshll.u32 %s2815_s21, 8  ;;  %s214_s8 = scalar_lea.vmem [#allocation2], %s2115_s27 }
  0x1a   : > { %s219_s7 = scalar_lea.hbm %s4530_s0, %s2256_s28  ;;  %s222_s9 = sshll.u32 %s214_s8, 4  ;;  %s223_s9 = int_to_ptr.vmem [resolvable:$true] %s222_s9 }
  0x1b   : > { %s220_s10 = sshll.u32 %s219_s7, 4  ;;  %p2933_p2 = pnand %p2319_p3, %p38_p5  ;;  %s221_s10 = int_to_ptr.hbm [resolvable:$true] %s220_s10 }
  0x1c   : > { %s211_s12 = scalar_lea.sflag [#allocation3], %s210_s26  ;;  %s2715_s13 = sshra.s32 %s221_s10, 4  ;;  %s2716_s13 = int_to_ptr.hbm [resolvable:$true] %s2715_s13 }
  0x1d   : > { %s2717_s15 = scalar_lea.hbm %s2716_s13, 256  ;;  %p2719_p9 = pneg %p2933_p2 }
  0x1e   : > { %p2718_p7 = scmp.ne.s32.totalorder %s2716_s13, %s2717_s15  ;;  %s2722_s28 = scalar_lea.hbm %s4530_s0, 1024 }
  0x1f   : > { %p2723_p12 = scmp.lt.s32.totalorder %s2716_s13, %s4530_s0  ;;  %p2724_p13 = scmp.lt.s32.totalorder %s2722_s28, %s2717_s15 }
  0x20   : > { %p2720_p10 = pnand %p2719_p9, %p2718_p7 }
  0x21   : > { %p2725_p3 = por %p2724_p13, %p2723_p12 }
  0x22   : > { %p2721_p11 = pneg %p2720_p10 }
  0x24   : > { %p2726_p5 = pnand %p2725_p3, %p2721_p11 }
  0x26   : > { %2729 = shalt.err (!%p2726_p5)
}
  0x27   : > { %s2821_s26 = smov 128   ;;  %s2822_s7 = smov 8  }
  0x28   : > { %2312 = dma.hbm_to_vmem [thread:$0]  (!%p2933_p2), %s221_s10, 4096, %s223_s9, %s211_s12, %s2821_s26, %s2821_s26, %s2822_s7  }
  0x29   : > { %234 = sbr.rel (%p2898_p8) target bundleno = 567 (0x237), region = 40  ;;  %s2950_s8 = sand.u32 (!%p2898_p8), 1, %s2807_s19  }
  0x2a   : > { %s2119_s13 = sshll.u32 (!%p2898_p8), %s2950_s8, 8  ;;  %s237_s15 = scalar_lea.sflag (!%p2898_p8), [#allocation3], %s2950_s8 }
  0x2b   : > { %s2956_s16 = scalar_lea.vmem (!%p2898_p8), [#allocation2], %s2119_s13 }
  0x2e   : > { %2790 = dma.done.wait (%p2885_p4), %s237_s15, 4096  }
  0x2f   : > { %2792 = vsyncadd (%p2885_p4), %s237_s15, 4294963200 }
  0x30   : > { %2794 = dma.done.wait (%p43_p1), [#allocation6], 2048  }
  0x31   : > { %2796 = vsyncadd (%p43_p1), [#allocation6], 4294965248  ;;  %v2264_v0 = vld [vmem:[#allocation5 + $0x38] sm:$0xff]  ;;  %v2263_v1 = vld [vmem:[#allocation5 + $0x30] sm:$0xff]  ;;  %s3926_s27 = scalar_lea.vmem [#allocation8], %s2119_s13  ;;  %s2273_s6 = sshll.u32 %s2876_s22, 8 }
  0x32   : > { %396 = vmatpush.bf16.msra.mxu0 %v2264_v0  ;;  %2274 = vmatpush.bf16.msra.mxu2 %v2264_v0  ;;  %v2262_v2 = vld [vmem:[#allocation5 + $0x28] sm:$0xff]  ;;  %v2261_v3 = vld [vmem:[#allocation5 + $0x20] sm:$0xff]  ;;  %v2260_v4 = vld [vmem:[#allocation5 + $0x18] sm:$0xff]  ;;  %s2014_s13 = scalar_lea.hbm %s4535_s5, %s2273_s6  ;;  %s2015_s22 = sshll.u32 %s3926_s27, 4  ;;  %s2016_s22 = int_to_ptr.vmem [resolvable:$true] %s2015_s22 }
  0x33   : > { %v2259_v5 = vld [vmem:[#allocation5 + $0x10] sm:$0xff]  ;;  %v2258_v6 = vld [vmem:[#allocation5 + $0x8] sm:$0xff]  ;;  %v2257_v7 = vld [vmem:[#allocation5] sm:$0xff]  ;;  %s2017_s15 = sshll.u32 %s2014_s13, 4  ;;  %s2003_s24 = scalar_lea.sflag [#allocation4], %s2950_s8  ;;  %s2018_s15 = int_to_ptr.hbm [resolvable:$true] %s2017_s15 }
  0x34   : > { %v280_v8 = vld [vmem:[%s2956_s16] sm:$0xff]  ;;  %v281_v9 = vld [vmem:[%s2956_s16 + $0x8] sm:$0xff]  ;;  %v282_v14 = vld [vmem:[%s2956_s16 + $0x10] sm:$0xff]  ;;  %s2759_s29 = sshra.s32 %s2018_s15, 4  ;;  %s2765_s12 = scalar_lea.hbm %s4535_s5, 1024  ;;  %s2760_s29 = int_to_ptr.hbm [resolvable:$true] %s2759_s29 }
  0x35   : > { %v296_v10 = vld [vmem:[%s2956_s16 + $0x80] sm:$0xff]  ;;  %v297_v11 = vld [vmem:[%s2956_s16 + $0x88] sm:$0xff]  ;;  %v312_v12 = vpack.c.bf16 %v281_v9, %v280_v8  ;;  %v283_v15 = vld [vmem:[%s2956_s16 + $0x18] sm:$0xff]  ;;  %s2761_s9 = scalar_lea.hbm %s2760_s29, 256  ;;  %p2766_p2 = scmp.lt.s32.totalorder %s2760_s29, %s4535_s5 }
  0x36   : > { %397 = vmatpush.bf16.msra.mxu0 %v2263_v1  ;;  %2275 = vmatpush.bf16.msra.mxu2 %v2263_v1  ;;  %v320_v13 = vpack.c.bf16 %v297_v11, %v296_v10  ;;  %v298_v16 = vld [vmem:[%s2956_s16 + $0x90] sm:$0xff]  ;;  %v299_v17 = vld [vmem:[%s2956_s16 + $0x98] sm:$0xff]  ;;  %v313_v18 = vpack.c.bf16 %v283_v15, %v282_v14  ;;  %v284_v20 = vld [vmem:[%s2956_s16 + $0x20] sm:$0xff]  ;;  %p2762_p1 = scmp.ne.s32.totalorder %s2760_s29, %s2761_s9  ;;  %p2767_p7 = scmp.lt.s32.totalorder %s2765_s12, %s2761_s9 }
  0x37   : > { %v321_v19 = vpack.c.bf16 %v299_v17, %v298_v16  ;;  %v285_v21 = vld [vmem:[%s2956_s16 + $0x28] sm:$0xff]  ;;  %v300_v22 = vld [vmem:[%s2956_s16 + $0xa0] sm:$0xff]  ;;  %v286_v26 = vld [vmem:[%s2956_s16 + $0x30] sm:$0xff] }
  0x38   : > { %v301_v23 = vld [vmem:[%s2956_s16 + $0xa8] sm:$0xff]  ;;  %v314_v24 = vpack.c.bf16 %v285_v21, %v284_v20  ;;  %v287_v27 = vld [vmem:[%s2956_s16 + $0x38] sm:$0xff]  ;;  %v302_v28 = vld [vmem:[%s2956_s16 + $0xb0] sm:$0xff]  ;;  %p2763_p4 = pnand %p2762_p1, %p2920_p0  ;;  %p2768_p9 = por %p2767_p7, %p2766_p2 }
  0x39   : > { %v322_v25 = vpack.c.bf16 %v301_v23, %v300_v22  ;;  %v303_v29 = vld [vmem:[%s2956_s16 + $0xb8] sm:$0xff]  ;;  %v315_v30 = vpack.c.bf16 %v287_v27, %v286_v26  ;;  %v288_v32 = vld [vmem:[%s2956_s16 + $0x40] sm:$0xff]  ;;  %v289_v33 = vld [vmem:[%s2956_s16 + $0x48] sm:$0xff] }
  0x3a   : > { %398 = vmatpush.bf16.msra.mxu0 %v2262_v2  ;;  %2276 = vmatpush.bf16.msra.mxu2 %v2262_v2  ;;  %v323_v31 = vpack.c.bf16 %v303_v29, %v302_v28  ;;  %v304_v34 = vld [vmem:[%s2956_s16 + $0xc0] sm:$0xff]  ;;  %v305_v35 = vld [vmem:[%s2956_s16 + $0xc8] sm:$0xff]  ;;  %v316_v36 = vpack.c.bf16 %v289_v33, %v288_v32  ;;  %v290_v38 = vld [vmem:[%s2956_s16 + $0x50] sm:$0xff]  ;;  %p2764_p8 = pneg %p2763_p4 }
  0x3b   : > { %v324_v37 = vpack.c.bf16 %v305_v35, %v304_v34  ;;  %v291_v39 = vld [vmem:[%s2956_s16 + $0x58] sm:$0xff]  ;;  %v306_v40 = vld [vmem:[%s2956_s16 + $0xd0] sm:$0xff]  ;;  %v292_v44 = vld [vmem:[%s2956_s16 + $0x60] sm:$0xff] }
  0x3c   : > { %v307_v41 = vld [vmem:[%s2956_s16 + $0xd8] sm:$0xff]  ;;  %v317_v42 = vpack.c.bf16 %v291_v39, %v290_v38  ;;  %v293_v45 = vld [vmem:[%s2956_s16 + $0x68] sm:$0xff]  ;;  %v308_v46 = vld [vmem:[%s2956_s16 + $0xe0] sm:$0xff]  ;;  %p2769_p10 = pnand %p2768_p9, %p2764_p8 }
  0x3d   : > { %v325_v43 = vpack.c.bf16 %v307_v41, %v306_v40  ;;  %v309_v47 = vld [vmem:[%s2956_s16 + $0xe8] sm:$0xff]  ;;  %v318_v48 = vpack.c.bf16 %v293_v45, %v292_v44  ;;  %v294_v50 = vld [vmem:[%s2956_s16 + $0x70] sm:$0xff]  ;;  %v2272_v51 = vld [vmem:[#allocation7 + $0x38] sm:$0xff] }
  0x3e   : > { %399 = vmatpush.bf16.msra.mxu0 %v2261_v3  ;;  %2277 = vmatpush.bf16.msra.mxu2 %v2261_v3  ;;  %v326_v49 = vpack.c.bf16 %v309_v47, %v308_v46  ;;  %v295_v52 = vld [vmem:[%s2956_s16 + $0x78] sm:$0xff]  ;;  %v310_v53 = vld [vmem:[%s2956_s16 + $0xf0] sm:$0xff]  ;;  %v2270_v58 = vld [vmem:[#allocation7 + $0x28] sm:$0xff] }
  0x3f   : > { %v311_v54 = vld [vmem:[%s2956_s16 + $0xf8] sm:$0xff]  ;;  %1209 = vmatpush.bf16.msra.mxu1 %v2272_v51  ;;  %2282 = vmatpush.bf16.msra.mxu3 %v2272_v51  ;;  %v319_v55 = vpack.c.bf16 %v295_v52, %v294_v50  ;;  %v2271_v57 = vld [vmem:[#allocation7 + $0x30] sm:$0xff]  ;;  %v2269_v59 = vld [vmem:[#allocation7 + $0x20] sm:$0xff] }
  0x40   : > { %v327_v56 = vpack.c.bf16 %v311_v54, %v310_v53  ;;  %v3001_v60 = vld [vmem:[%s4532_s2] ss:$0 sm:$0xff]  ;;  %v2268_v61 = vld [vmem:[#allocation7 + $0x18] sm:$0xff]  ;;  %v2267_v0 = vld [vmem:[#allocation7 + $0x10] sm:$0xff] }
  0x41   : > { %v2266_v3 = vld [vmem:[#allocation7 + $0x8] sm:$0xff] }
  0x42   : > { %400 = vmatpush.bf16.msra.mxu0 %v2260_v4  ;;  %2278 = vmatpush.bf16.msra.mxu2 %v2260_v4 }
  0x43   : > { %1210 = vmatpush.bf16.msra.mxu1 %v2271_v57  ;;  %2283 = vmatpush.bf16.msra.mxu3 %v2271_v57 }
  0x46   : > { %401 = vmatpush.bf16.msra.mxu0 %v2259_v5  ;;  %2279 = vmatpush.bf16.msra.mxu2 %v2259_v5 }
  0x47   : > { %1211 = vmatpush.bf16.msra.mxu1 %v2270_v58  ;;  %2284 = vmatpush.bf16.msra.mxu3 %v2270_v58 }
  0x4a   : > { %402 = vmatpush.bf16.msra.mxu0 %v2258_v6  ;;  %2280 = vmatpush.bf16.msra.mxu2 %v2258_v6 }
  0x4b   : > { %1212 = vmatpush.bf16.msra.mxu1 %v2269_v59  ;;  %2285 = vmatpush.bf16.msra.mxu3 %v2269_v59 }
  0x4e   : > { %403 = vmatpush.bf16.msra.mxu0 %v2257_v7  ;;  %2281 = vmatpush.bf16.msra.mxu2 %v2257_v7 }
  0x4f   : > { %1213 = vmatpush.bf16.msra.mxu1 %v2268_v61  ;;  %2286 = vmatpush.bf16.msra.mxu3 %v2268_v61 }
  0x51   : > { %404 = vmatmul.bf16.vlgmr.msra.gmra.mxu0 %v312_v12  ;;  %444 = vmatmul.bf16.vlgmr.msra.gmra.mxu2 %v320_v13  ;;  %v2265_v12 = vld [vmem:[#allocation7] sm:$0xff] }
  0x53   : > { %1214 = vmatpush.bf16.msra.mxu1 %v2267_v0  ;;  %2287 = vmatpush.bf16.msra.mxu3 %v2267_v0 }
  0x57   : > { %1215 = vmatpush.bf16.msra.mxu1 %v2266_v3  ;;  %2288 = vmatpush.bf16.msra.mxu3 %v2266_v3 }
  0x5b   : > { %1216 = vmatpush.bf16.msra.mxu1 %v2265_v12  ;;  %2289 = vmatpush.bf16.msra.mxu3 %v2265_v12 }
  0x61   : > { %409 = vmatmul.bf16.gmra.mxu0 %v313_v18  ;;  %449 = vmatmul.bf16.gmra.mxu2 %v321_v19 }
  0x71   : > { %414 = vmatmul.bf16.gmra.mxu0 %v314_v24  ;;  %454 = vmatmul.bf16.gmra.mxu2 %v322_v25 }
  0x81   : > { %419 = vmatmul.bf16.gmra.mxu0 %v315_v30  ;;  %459 = vmatmul.bf16.gmra.mxu2 %v323_v31 }
  0x91   : > { %424 = vmatmul.bf16.gmra.mxu0 %v316_v36  ;;  %464 = vmatmul.bf16.gmra.mxu2 %v324_v37 }
  0xa1   : > { %429 = vmatmul.bf16.gmra.mxu0 %v317_v42  ;;  %469 = vmatmul.bf16.gmra.mxu2 %v325_v43 }
  0xb1   : > { %434 = vmatmul.bf16.gmra.mxu0 %v318_v48  ;;  %474 = vmatmul.bf16.gmra.mxu2 %v326_v49 }
  0xc1   : > { %439 = vmatmul.bf16.gmra.mxu0 %v319_v55  ;;  %479 = vmatmul.bf16.gmra.mxu2 %v327_v56 }
  0xce   : > { %v405_v62 = vpop.f32.mrf.mxu0 }
  0xcf   : > { %v3004_v63 = vadd.f32 %v3001_v60, %v405_v62 }
  0xd1   : > { %v2155_v1 = vmul.f32 -1.442695, %v3004_v63 }
  0xd3   : > { %2365 = vpow2.f32 %v2155_v1 }
  0xd4   : > { %v445_v2 = vpop.f32.mrf.mxu2 }
  0xd5   : > { %v3008_v4 = vadd.f32 %v3001_v60, %v445_v2 }
  0xd6   : > { %v407_v5 = vpop.f32.mrf.mxu0 }
  0xd7   : > { %v2171_v6 = vmul.f32 -1.442695, %v3008_v4  ;;  %v3012_v7 = vadd.f32 %v3001_v60, %v407_v5 }
  0xd9   : > { %v2366_v8 = vpop.eup %2365  ;;  %2367 = vpow2.f32 %v2171_v6  ;;  %v2156_v9 = vmul.f32 -1.442695, %v3012_v7 }
  0xda   : > { %v581_v10 = vadd.f32 1.0, %v2366_v8 }
  0xdb   : > { %2369 = vpow2.f32 %v2156_v9 }
  0xdc   : > { %2371 = vrcp.f32 %v581_v10  ;;  %v447_v11 = vpop.f32.mrf.mxu2  ;;  %vm618_vm0 = vweird.f32 %v581_v10  ;;  %v622_v40 = vand.u32 2147483647, %v581_v10  ;;  %v624_v41 = vand.u32 2147483648, %v581_v10 }
  0xdd   : > { %v3016_v13 = vadd.f32 %v3001_v60, %v447_v11 }
  0xde   : > { %v410_v14 = vpop.f32.mrf.mxu0  ;;  %vm3071_vm3 = vcmp.eq.f32.partialorder %v622_v40, 8.507059e+37  ;;  %v625_v53 = vor.u32 1.1754944e-38, %v624_v41 }
  0xdf   : > { %v2368_v15 = vpop.eup %2367  ;;  %v2172_v16 = vmul.f32 -1.442695, %v3016_v13  ;;  %v3020_v17 = vadd.f32 %v3001_v60, %v410_v14 }
  0xe0   : > { %v3022_v18 = vadd.f32 1.0, %v2368_v15 }
  0xe1   : > { %v2370_v19 = vpop.eup %2369  ;;  %2373 = vpow2.f32 %v2172_v16  ;;  %v2157_v20 = vmul.f32 -1.442695, %v3020_v17 }
  0xe2   : > { %v3025_v21 = vpop.eup %2371  ;;  %2375 = vrcp.f32 %v3022_v18  ;;  %v3029_v23 = vadd.f32 1.0, %v2370_v19  ;;  %v862_v54 = vand.u32 2147483647, %v3022_v18  ;;  %vm858_vm4 = vweird.f32 %v3022_v18 }
  0xe3   : > { %v614_v22 = vmul.f32 %v3025_v21, %v581_v10  ;;  %2377 = vpow2.f32 %v2157_v20  ;;  %vm619_vm1 = vweird.f32 %v3025_v21  ;;  %v864_v57 = vand.u32 2147483648, %v3022_v18 }
  0xe4   : > { %v450_v24 = vpop.f32.mrf.mxu2  ;;  %2379 = vrcp.f32 %v3029_v23  ;;  %vm3058_vm2 = vmor %vm618_vm0, %vm619_vm1  ;;  %v637_v62 = vand.u32 2147483647, %v3029_v23  ;;  %vm3093_vm6 = vcmp.eq.f32.partialorder %v862_v54, 8.507059e+37  ;;  %vm633_vm8 = vweird.f32 %v3029_v23 }
  0xe5   : > { %v615_v25 = vsub.f32 1.0, %v614_v22  ;;  %v3033_v26 = vadd.f32 %v3001_v60, %v450_v24  ;;  %v865_v11 = vor.u32 1.1754944e-38, %v864_v57  ;;  %v639_v12 = vand.u32 2147483648, %v3029_v23 }
  0xe6   : > { %v412_v27 = vpop.f32.mrf.mxu0  ;;  %vm3113_vm10 = vcmp.eq.f32.partialorder %v637_v62, 8.507059e+37 }
  0xe7   : > { %v2374_v28 = vpop.eup %2373  ;;  %v3036_v29 = vadd.f32 %v3001_v60, %v412_v27  ;;  %v2173_v32 = vmul.f32 -1.442695, %v3033_v26  ;;  %v616_v35 = vmul.f32 %v3025_v21, %v615_v25 }
  0xe8   : > { %v3038_v30 = vpop.eup %2375  ;;  %v3040_v31 = vadd.f32 1.0, %v2374_v28 }
  0xe9   : > { %v2378_v33 = vpop.eup %2377  ;;  %v854_v34 = vmul.f32 %v3038_v30, %v3022_v18  ;;  %v2158_v39 = vmul.f32 -1.442695, %v3036_v29  ;;  %v617_v44 = vadd.f32 %v3025_v21, %v616_v35  ;;  %vm859_vm5 = vweird.f32 %v3038_v30 }
  0xea   : > { %2381 = vrcp.f32 %v3040_v31  ;;  %v3047_v36 = vpop.eup %2379  ;;  %v3049_v38 = vadd.f32 1.0, %v2378_v33  ;;  %vm3109_vm9 = vmor %vm858_vm4, %vm859_vm5  ;;  %v877_v20 = vand.u32 2147483647, %v3040_v31  ;;  %vm873_vm13 = vweird.f32 %v3040_v31 }
  0xeb   : > { %v855_v37 = vsub.f32 1.0, %v854_v34  ;;  %2383 = vpow2.f32 %v2173_v32  ;;  %v629_v42 = vmul.f32 %v3047_v36, %v3029_v23  ;;  %v621_v61 = vsel %vm3058_vm2, %v3025_v21, %v617_v44 }
  0xec   : > { %v452_v43 = vpop.f32.mrf.mxu2  ;;  %2385 = vrcp.f32 %v3049_v38  ;;  %vm634_vm7 = vweird.f32 %v3047_v36  ;;  %v626_v15 = vsel %vm3071_vm3, %v625_v53, %v621_v61  ;;  %v640_v32 = vor.u32 1.1754944e-38, %v639_v12 }
  0xed   : > { %v630_v45 = vsub.f32 1.0, %v629_v42  ;;  %v856_v48 = vmul.f32 %v3038_v30, %v855_v37  ;;  %2387 = vpow2.f32 %v2158_v39  ;;  %v3064_v49 = vadd.f32 %v3001_v60, %v452_v43  ;;  %vm3125_vm11 = vmor %vm633_vm8, %vm634_vm7 }
  0xee   : > { %v415_v46 = vpop.f32.mrf.mxu0  ;;  %v879_v33 = vand.u32 2147483648, %v3040_v31  ;;  %v654_v34 = vand.u32 2147483648, %v3049_v38  ;;  %v1093_v41 = vmul.f32 %v626_v15, %v3004_v63  ;;  %vm3162_vm15 = vcmp.eq.f32.partialorder %v877_v20, 8.507059e+37 }
  0xef   : > { %v3067_v50 = vadd.f32 %v3001_v60, %v415_v46  ;;  %v631_v55 = vmul.f32 %v3047_v36, %v630_v45  ;;  %v2174_v59 = vmul.f32 -1.442695, %v3064_v49  ;;  %v857_v1 = vadd.f32 %v3038_v30, %v856_v48 }
  0xf0   : > { %v3069_v51 = vpop.eup %2381  ;;  %v652_v46 = vand.u32 2147483647, %v3049_v38  ;;  %v880_v53 = vor.u32 1.1754944e-38, %v879_v33  ;;  %vm648_vm0 = vweird.f32 %v3049_v38  ;;  %v3175_v54 = vor.u32 1.1754944e-38, %v654_v34 }
  0xf1   : > { %v2384_v56 = vpop.eup %2383  ;;  %v869_v58 = vmul.f32 %v3069_v51, %v3040_v31  ;;  %2389 = vpow2.f32 %v2174_v59  ;;  %v2159_v3 = vmul.f32 -1.442695, %v3067_v50  ;;  %v632_v8 = vadd.f32 %v3047_v36, %v631_v55 }
  0xf2   : > { %v3087_v0 = vadd.f32 1.0, %v2384_v56  ;;  %v3091_v5 = vpop.eup %2385  ;;  %v861_v23 = vsel %vm3109_vm9, %v3038_v30, %v857_v1  ;;  %vm874_vm12 = vweird.f32 %v3069_v51  ;;  %vm3186_vm2 = vcmp.eq.f32.partialorder %v652_v46, 8.507059e+37 }
  0xf3   : > { %v870_v2 = vsub.f32 1.0, %v869_v58  ;;  %v2388_v10 = vpop.eup %2387  ;;  %v636_v25 = vsel %vm3125_vm11, %v3047_v36, %v632_v8  ;;  %v644_v28 = vmul.f32 %v3091_v5, %v3049_v38  ;;  %v866_v36 = vsel %vm3093_vm6, %v865_v11, %v861_v23  ;;  %vm3158_vm14 = vmor %vm873_vm13, %vm874_vm12 }
  0xf4   : > { %2391 = vrcp.f32 %v3087_v0  ;;  %v455_v9 = vpop.f32.mrf.mxu2  ;;  %v3118_v21 = vadd.f32 1.0, %v2388_v10  ;;  %v641_v42 = vsel %vm3113_vm10, %v640_v32, %v636_v25  ;;  %v1109_v52 = vmul.f32 %v866_v36, %v3008_v4 }
  0xf5   : > { %v871_v14 = vmul.f32 %v3069_v51, %v870_v2  ;;  %2393 = vpow2.f32 %v2159_v3  ;;  %v3131_v24 = vadd.f32 %v3001_v60, %v455_v9  ;;  %v645_v45 = vsub.f32 1.0, %v644_v28 }
  0xf6   : > { %v417_v22 = vpop.f32.mrf.mxu0  ;;  %2395 = vrcp.f32 %v3118_v21  ;;  %v1094_v56 = vmul.f32 %v641_v42, %v3012_v7  ;;  %vm649_vm1 = vweird.f32 %v3091_v5  ;;  %v892_v7 = vand.u32 2147483647, %v3087_v0 }
  0xf7   : > { %v872_v27 = vadd.f32 %v3069_v51, %v871_v14  ;;  %v2390_v30 = vpop.eup %2389  ;;  %v2175_v39 = vmul.f32 -1.442695, %v3131_v24  ;;  %v3151_v40 = vadd.f32 %v3001_v60, %v417_v22  ;;  %v646_v62 = vmul.f32 %v3091_v5, %v645_v45  ;;  %vm3216_vm7 = vmor %vm648_vm0, %vm649_vm1 }
  0xf8   : > { %v3147_v37 = vadd.f32 1.0, %v2390_v30  ;;  %v894_v2 = vand.u32 2147483648, %v3087_v0  ;;  %vm888_vm3 = vweird.f32 %v3087_v0  ;;  %v667_v6 = vand.u32 2147483647, %v3118_v21 }
  0xf9   : > { %v876_v63 = vsel %vm3158_vm14, %v3069_v51, %v872_v27  ;;  %v2160_v51 = vmul.f32 -1.442695, %v3151_v40  ;;  %v669_v8 = vand.u32 2147483648, %v3118_v21  ;;  %v1125_v11 = vpack.c.bf16 %v1094_v56, %v1093_v41 }
  0xfa   : > { %v3143_v35 = vpop.eup %2391  ;;  %2397 = vrcp.f32 %v3147_v37  ;;  %v881_v59 = vsel %vm3162_vm15, %v880_v53, %v876_v63  ;;  %v647_v22 = vadd.f32 %v3091_v5, %v646_v62  ;;  %vm663_vm6 = vweird.f32 %v3118_v21 }
  0xfb   : > { %v884_v44 = vmul.f32 %v3143_v35, %v3087_v0  ;;  %v2394_v48 = vpop.eup %2393  ;;  %2399 = vpow2.f32 %v2175_v39  ;;  %v1110_v10 = vmul.f32 %v881_v59, %v3016_v13  ;;  %vm889_vm5 = vweird.f32 %v3143_v35  ;;  %1217 = vmatmul.bf16.vlgmr.msra.gmra.mxu1 %v1125_v11 }
  0xfc   : > { %v457_v47 = vpop.f32.mrf.mxu2  ;;  %v2396_v55 = vpop.eup %2395  ;;  %v3178_v57 = vadd.f32 1.0, %v2394_v48  ;;  %vm3220_vm8 = vcmp.eq.f32.partialorder %v667_v6, 8.507059e+37  ;;  %v670_v31 = vor.u32 1.1754944e-38, %v669_v8  ;;  %vm903_vm11 = vweird.f32 %v3147_v37  ;;  %vm3257_vm12 = vmor %vm888_vm3, %vm889_vm5 }
  0xfd   : > { %v885_v4 = vsub.f32 1.0, %v884_v44  ;;  %v659_v61 = vmul.f32 %v2396_v55, %v3118_v21  ;;  %v3200_v12 = vadd.f32 %v3001_v60, %v457_v47  ;;  %vm664_vm4 = vweird.f32 %v2396_v55 }
  0xfe   : > { %v420_v58 = vpop.f32.mrf.mxu0  ;;  %2401 = vrcp.f32 %v3178_v57  ;;  %vm3229_vm9 = vmor %vm663_vm6, %vm664_vm4  ;;  %v1133_v33 = vpack.c.bf16 %v1110_v10, %v1109_v52  ;;  %v651_v44 = vsel %vm3216_vm7, %v3091_v5, %v647_v22  ;;  %v909_v47 = vand.u32 2147483648, %v3147_v37 }
  0xff   : > { %v660_v3 = vsub.f32 1.0, %v659_v61  ;;  %2403 = vpow2.f32 %v2160_v51  ;;  %v3203_v14 = vadd.f32 %v3001_v60, %v420_v58  ;;  %v886_v15 = vmul.f32 %v3143_v35, %v885_v4 }
 0x100   : > { %v3196_v9 = vpop.eup %2397  ;;  %v2176_v13 = vmul.f32 -1.442695, %v3200_v12  ;;  %1257 = vmatmul.bf16.vlgmr.msra.gmra.mxu3 %v1133_v33  ;;  %v907_v48 = vand.u32 2147483647, %v3147_v37  ;;  %vm893_vm14 = vcmp.eq.f32.partialorder %v892_v7, 8.507059e+37  ;;  %v895_v61 = vor.u32 1.1754944e-38, %v894_v2 }
 0x101   : > { %v661_v16 = vmul.f32 %v2396_v55, %v660_v3  ;;  %v899_v19 = vmul.f32 %v3196_v9, %v3147_v37  ;;  %v2400_v20 = vpop.eup %2399  ;;  %v2161_v38 = vmul.f32 -1.442695, %v3203_v14  ;;  %v887_v41 = vadd.f32 %v3143_v35, %v886_v15 }
 0x102   : > { %v3224_v30 = vadd.f32 1.0, %v2400_v20  ;;  %2405 = vpow2.f32 %v2176_v13  ;;  %vm904_vm10 = vweird.f32 %v3196_v9  ;;  %v910_v62 = vor.u32 1.1754944e-38, %v909_v47 }
 0x103   : > { %v662_v25 = vadd.f32 %v2396_v55, %v661_v16  ;;  %v900_v28 = vsub.f32 1.0, %v899_v19  ;;  %v891_v56 = vsel %vm3257_vm12, %v3143_v35, %v887_v41  ;;  %vm3273_vm13 = vmor %vm903_vm11, %vm904_vm10  ;;  %vm908_vm15 = vcmp.eq.f32.partialorder %v907_v48, 8.507059e+37 }
 0x104   : > { %v460_v23 = vpop.f32.mrf.mxu2  ;;  %v3226_v21 = vpop.eup %2401  ;;  %2407 = vrcp.f32 %v3224_v30  ;;  %v682_v11 = vand.u32 2147483647, %v3178_v57  ;;  %v684_v7 = vand.u32 2147483648, %v3178_v57  ;;  %vm678_vm0 = vweird.f32 %v3178_v57 }
 0x105   : > { %v3235_v34 = vadd.f32 %v3001_v60, %v460_v23  ;;  %v2404_v39 = vpop.eup %2403  ;;  %v666_v42 = vsel %vm3229_vm9, %v2396_v55, %v662_v25  ;;  %v901_v43 = vmul.f32 %v3196_v9, %v900_v28  ;;  %v674_v63 = vmul.f32 %v3226_v21, %v3178_v57 }
 0x106   : > { %v422_v36 = vpop.f32.mrf.mxu0  ;;  %v671_v45 = vsel %vm3220_vm8, %v670_v31, %v666_v42  ;;  %v3262_v52 = vadd.f32 1.0, %v2404_v39  ;;  %2409 = vpow2.f32 %v2161_v38  ;;  %v656_v55 = vsel %vm3186_vm2, %v3175_v54, %v651_v44 }
 0x107   : > { %v902_v46 = vadd.f32 %v3196_v9, %v901_v43  ;;  %v2177_v53 = vmul.f32 -1.442695, %v3235_v34  ;;  %v3278_v37 = vadd.f32 %v3001_v60, %v422_v36  ;;  %v1096_v59 = vmul.f32 %v671_v45, %v3036_v29 }
 0x108   : > { %v2406_v58 = vpop.eup %2405  ;;  %v675_v4 = vsub.f32 1.0, %v674_v63  ;;  %2411 = vrcp.f32 %v3262_v52  ;;  %v1095_v29 = vmul.f32 %v656_v55, %v3020_v17  ;;  %vm679_vm1 = vweird.f32 %v3226_v21 }
 0x109   : > { %v906_v54 = vsel %vm3273_vm13, %v3196_v9, %v902_v46  ;;  %v3289_v1 = vadd.f32 1.0, %v2406_v58  ;;  %2413 = vpow2.f32 %v2177_v53  ;;  %v2162_v6 = vmul.f32 -1.442695, %v3278_v37  ;;  %vm3323_vm3 = vmor %vm678_vm0, %vm679_vm1 }
 0x10a   : > { %v3291_v3 = vpop.eup %2407  ;;  %v896_v9 = vsel %vm893_vm14, %v895_v61, %v891_v56  ;;  %v911_v10 = vsel %vm908_vm15, %v910_v62, %v906_v54  ;;  %v676_v2 = vmul.f32 %v3226_v21, %v675_v4  ;;  %v1126_v17 = vpack.c.bf16 %v1096_v59, %v1095_v29 }
 0x10b   : > { %v914_v15 = vmul.f32 %v3291_v3, %v3224_v30  ;;  %2415 = vrcp.f32 %v3289_v1  ;;  %v1112_v20 = vmul.f32 %v911_v10, %v3064_v49  ;;  %v924_v22 = vand.u32 2147483648, %v3224_v30 }
 0x10c   : > { %v462_v35 = vpop.f32.mrf.mxu2  ;;  %v2410_v0 = vpop.eup %2409  ;;  %2417 = vpow2.f32 %v2162_v6  ;;  %v1111_v23 = vmul.f32 %v896_v9, %v3033_v26  ;;  %vm3311_vm2 = vcmp.eq.f32.partialorder %v682_v11, 8.507059e+37  ;;  %v685_v25 = vor.u32 1.1754944e-38, %v684_v7  ;;  %1222 = vmatmul.bf16.gmra.mxu1 %v1126_v17 }
 0x10d   : > { %v3303_v16 = vadd.f32 1.0, %v2410_v0  ;;  %v3308_v13 = vadd.f32 %v3001_v60, %v462_v35  ;;  %v677_v32 = vadd.f32 %v3226_v21, %v676_v2  ;;  %v915_v38 = vsub.f32 1.0, %v914_v15 }
 0x10e   : > { %v425_v8 = vpop.f32.mrf.mxu0  ;;  %v2412_v19 = vpop.eup %2411  ;;  %v697_v49 = vand.u32 2147483647, %v3262_v52  ;;  %v922_v36 = vand.u32 2147483647, %v3224_v30  ;;  %v699_v41 = vand.u32 2147483648, %v3262_v52  ;;  %vm918_vm4 = vweird.f32 %v3224_v30 }
 0x10f   : > { %v689_v27 = vmul.f32 %v2412_v19, %v3262_v52  ;;  %v2414_v28 = vpop.eup %2413  ;;  %2419 = vrcp.f32 %v3303_v16  ;;  %v3334_v43 = vor.u32 1.1754944e-38, %v924_v22  ;;  %v2178_v44 = vmul.f32 -1.442695, %v3308_v13 }
 0x110   : > { %v3329_v42 = vadd.f32 1.0, %v2414_v28  ;;  %v3338_v57 = vadd.f32 %v3001_v60, %v425_v8  ;;  %v1134_v63 = vpack.c.bf16 %v1112_v20, %v1111_v23  ;;  %vm693_vm5 = vweird.f32 %v3262_v52 }
 0x111   : > { %v690_v39 = vsub.f32 1.0, %v689_v27  ;;  %v3331_v31 = vpop.eup %2415  ;;  %vm694_vm6 = vweird.f32 %v2412_v19  ;;  %v681_v48 = vsel %vm3323_vm3, %v3226_v21, %v677_v32  ;;  %v916_v53 = vmul.f32 %v3291_v3, %v915_v38 }
 0x112   : > { %v929_v47 = vmul.f32 %v3331_v31, %v3289_v1  ;;  %v2418_v5 = vpop.eup %2417  ;;  %vm3347_vm7 = vcmp.eq.f32.partialorder %v697_v49, 8.507059e+37  ;;  %2421 = vrcp.f32 %v3329_v42  ;;  %1262 = vmatmul.bf16.gmra.mxu3 %v1134_v63  ;;  %vm919_vm8 = vweird.f32 %v3291_v3  ;;  %vm695_vm10 = vmor %vm693_vm5, %vm694_vm6 }
 0x113   : > { %v691_v46 = vmul.f32 %v2412_v19, %v690_v39  ;;  %v700_v51 = vor.u32 1.1754944e-38, %v699_v41  ;;  %vm3355_vm9 = vcmp.eq.f32.partialorder %v922_v36, 8.507059e+37  ;;  %v3361_v21 = vadd.f32 1.0, %v2418_v5  ;;  %vm3392_vm12 = vmor %vm918_vm4, %vm919_vm8 }
 0x114   : > { %v465_v33 = vpop.f32.mrf.mxu2  ;;  %v930_v58 = vsub.f32 1.0, %v929_v47  ;;  %2423 = vpow2.f32 %v2178_v44  ;;  %v2163_v4 = vmul.f32 -1.442695, %v3338_v57  ;;  %v686_v61 = vsel %vm3311_vm2, %v685_v25, %v681_v48 }
 0x115   : > { %v692_v56 = vadd.f32 %v2412_v19, %v691_v46  ;;  %v3353_v59 = vpop.eup %2419  ;;  %v3365_v35 = vadd.f32 %v3001_v60, %v465_v33  ;;  %v937_v29 = vand.u32 2147483647, %v3289_v1  ;;  %v917_v52 = vadd.f32 %v3291_v3, %v916_v53 }
 0x116   : > { %v427_v45 = vpop.f32.mrf.mxu0  ;;  %v704_v6 = vmul.f32 %v3353_v59, %v3303_v16  ;;  %v931_v9 = vmul.f32 %v3331_v31, %v930_v58  ;;  %2425 = vrcp.f32 %v3361_v21  ;;  %vm933_vm11 = vweird.f32 %v3289_v1 }
 0x117   : > { %v696_v62 = vsel %vm695_vm10, %v2412_v19, %v692_v56  ;;  %v939_v11 = vand.u32 2147483648, %v3289_v1  ;;  %v712_v0 = vand.u32 2147483647, %v3303_v16  ;;  %2427 = vpow2.f32 %v2163_v4 }
 0x118   : > { %v701_v8 = vsel %vm3347_vm7, %v700_v51, %v696_v62  ;;  %v705_v7 = vsub.f32 1.0, %v704_v6  ;;  %v3380_v2 = vpop.eup %2421  ;;  %v2179_v17 = vmul.f32 -1.442695, %v3365_v35  ;;  %v3385_v19 = vadd.f32 %v3001_v60, %v427_v45 }
 0x119   : > { %v1098_v15 = vmul.f32 %v701_v8, %v3151_v40  ;;  %v1097_v20 = vmul.f32 %v686_v61, %v3067_v50  ;;  %vm3396_vm13 = vcmp.eq.f32.partialorder %v937_v29, 8.507059e+37  ;;  %v714_v40 = vand.u32 2147483648, %v3303_v16 }
 0x11a   : > { %v944_v18 = vmul.f32 %v3380_v2, %v3329_v42  ;;  %v2424_v27 = vpop.eup %2423  ;;  %v921_v50 = vsel %vm3392_vm12, %v3291_v3, %v917_v52  ;;  %v932_v30 = vadd.f32 %v3331_v31, %v931_v9  ;;  %vm934_vm14 = vweird.f32 %v3331_v31 }
 0x11b   : > { %2429 = vpow2.f32 %v2179_v17  ;;  %v940_v28 = vor.u32 1.1754944e-38, %v939_v11  ;;  %v706_v32 = vmul.f32 %v3353_v59, %v705_v7  ;;  %vm708_vm15 = vweird.f32 %v3303_v16  ;;  %vm3422_vm1 = vmor %vm933_vm11, %vm934_vm14 }
 0x11c   : > { %v467_v10 = vpop.f32.mrf.mxu2  ;;  %v3410_v38 = vadd.f32 1.0, %v2424_v27  ;;  %v2426_v49 = vpop.eup %2425  ;;  %vm3412_vm0 = vcmp.eq.f32.partialorder %v712_v0, 8.507059e+37  ;;  %v945_v26 = vsub.f32 1.0, %v944_v18  ;;  %v2164_v3 = vmul.f32 -1.442695, %v3385_v19 }
 0x11d   : > { %v1127_v36 = vpack.c.bf16 %v1098_v15, %v1097_v20  ;;  %v926_v39 = vsel %vm3355_vm9, %v3334_v43, %v921_v50  ;;  %vm709_vm2 = vweird.f32 %v3353_v59  ;;  %v715_v44 = vor.u32 1.1754944e-38, %v714_v40  ;;  %v2428_v45 = vpop.eup %2427 }
 0x11e   : > { %v430_v25 = vpop.f32.mrf.mxu0  ;;  %v719_v63 = vmul.f32 %v2426_v49, %v3361_v21  ;;  %v936_v46 = vsel %vm3422_vm1, %v3331_v31, %v932_v30  ;;  %vm948_vm3 = vweird.f32 %v3329_v42  ;;  %2431 = vrcp.f32 %v3410_v38  ;;  %vm3441_vm4 = vmor %vm708_vm15, %vm709_vm2 }
 0x11f   : > { %1227 = vmatmul.bf16.gmra.mxu1 %v1127_v36  ;;  %v3434_v1 = vadd.f32 %v3001_v60, %v467_v10  ;;  %v707_v43 = vadd.f32 %v3353_v59, %v706_v32  ;;  %v952_v47 = vand.u32 2147483647, %v3329_v42  ;;  %v954_v5 = vand.u32 2147483648, %v3329_v42 }
 0x120   : > { %v720_v48 = vsub.f32 1.0, %v719_v63  ;;  %v946_v55 = vmul.f32 %v3380_v2, %v945_v26  ;;  %v729_v56 = vand.u32 2147483648, %v3361_v21  ;;  %v3447_v51 = vadd.f32 1.0, %v2428_v45 }
 0x121   : > { %v2430_v53 = vpop.eup %2429  ;;  %2433 = vpow2.f32 %v2164_v3  ;;  %v941_v54 = vsel %vm3396_vm13, %v940_v28, %v936_v46  ;;  %vm724_vm5 = vweird.f32 %v2426_v49  ;;  %vm723_vm6 = vweird.f32 %v3361_v21 }
 0x122   : > { %v721_v4 = vmul.f32 %v2426_v49, %v720_v48  ;;  %v3451_v61 = vadd.f32 1.0, %v2430_v53  ;;  %v727_v16 = vand.u32 2147483647, %v3361_v21  ;;  %2435 = vrcp.f32 %v3447_v51  ;;  %vm725_vm8 = vmor %vm723_vm6, %vm724_vm5 }
 0x123   : > { %v2180_v62 = vmul.f32 -1.442695, %v3434_v1  ;;  %v711_v29 = vsel %vm3441_vm4, %v3353_v59, %v707_v43  ;;  %v3462_v52 = vadd.f32 %v3001_v60, %v430_v25  ;;  %v1113_v10 = vmul.f32 %v926_v39, %v3131_v24 }
 0x124   : > { %v470_v58 = vpop.f32.mrf.mxu2  ;;  %v722_v6 = vadd.f32 %v2426_v49, %v721_v4  ;;  %2437 = vrcp.f32 %v3451_v61  ;;  %v3464_v9 = vpop.eup %2431  ;;  %v1114_v21 = vmul.f32 %v941_v54, %v3200_v12  ;;  %v947_v11 = vadd.f32 %v3380_v2, %v946_v55 }
 0x125   : > { %vm949_vm7 = vweird.f32 %v3380_v2  ;;  %vm3471_vm9 = vcmp.eq.f32.partialorder %v952_v47, 8.507059e+37  ;;  %v730_v0 = vor.u32 1.1754944e-38, %v729_v56  ;;  %v959_v15 = vmul.f32 %v3464_v9, %v3410_v38 }
 0x126   : > { %v432_v8 = vpop.f32.mrf.mxu0  ;;  %v726_v7 = vsel %vm725_vm8, %v2426_v49, %v722_v6  ;;  %v716_v24 = vsel %vm3412_vm0, %v715_v44, %v711_v29  ;;  %v955_v12 = vor.u32 1.1754944e-38, %v954_v5  ;;  %vm728_vm10 = vcmp.eq.f32.partialorder %v727_v16, 8.507059e+37  ;;  %vm3481_vm11 = vmor %vm948_vm3, %vm949_vm7 }
 0x127   : > { %v2434_v17 = vpop.eup %2433  ;;  %2439 = vpow2.f32 %v2180_v62  ;;  %v731_v22 = vsel %vm728_vm10, %v730_v0, %v726_v7  ;;  %v960_v23 = vsub.f32 1.0, %v959_v15  ;;  %v2165_v18 = vmul.f32 -1.442695, %v3462_v52 }
 0x128   : > { %v3485_v40 = vadd.f32 1.0, %v2434_v17  ;;  %v3488_v25 = vpop.eup %2435  ;;  %v951_v27 = vsel %vm3481_vm11, %v3380_v2, %v947_v11  ;;  %vm964_vm12 = vweird.f32 %v3464_v9  ;;  %v1135_v50 = vpack.c.bf16 %v1114_v21, %v1113_v10 }
 0x129   : > { %v3495_v42 = vadd.f32 %v3001_v60, %v470_v58  ;;  %v961_v28 = vmul.f32 %v3464_v9, %v960_v23  ;;  %v734_v32 = vmul.f32 %v3488_v25, %v3447_v51  ;;  %v3504_v49 = vadd.f32 %v3001_v60, %v432_v8 }
 0x12a   : > { %v3497_v30 = vpop.eup %2437  ;;  %2441 = vrcp.f32 %v3485_v40  ;;  %v1100_v2 = vmul.f32 %v731_v22, %v3278_v37  ;;  %vm963_vm13 = vweird.f32 %v3410_v38  ;;  %v967_v33 = vand.u32 2147483647, %v3410_v38  ;;  %1267 = vmatmul.bf16.gmra.mxu3 %v1135_v50 }
 0x12b   : > { %v969_v26 = vand.u32 2147483648, %v3410_v38  ;;  %v962_v36 = vadd.f32 %v3464_v9, %v961_v28  ;;  %v735_v39 = vsub.f32 1.0, %v734_v32  ;;  %v974_v41 = vmul.f32 %v3497_v30, %v3451_v61  ;;  %vm3518_vm14 = vmor %vm963_vm13, %vm964_vm12 }
 0x12c   : > { %v472_v3 = vpop.f32.mrf.mxu2  ;;  %2443 = vpow2.f32 %v2165_v18  ;;  %v1099_v63 = vmul.f32 %v716_v24, %v3203_v14  ;;  %v956_v37 = vsel %vm3471_vm9, %v955_v12, %v951_v27  ;;  %v742_v38 = vand.u32 2147483647, %v3447_v51 }
 0x12d   : > { %v2440_v44 = vpop.eup %2439  ;;  %v2181_v46 = vmul.f32 -1.442695, %v3495_v42  ;;  %v966_v43 = vsel %vm3518_vm14, %v3464_v9, %v962_v36  ;;  %v2166_v14 = vmul.f32 -1.442695, %v3504_v49  ;;  %v3531_v5 = vadd.f32 %v3001_v60, %v472_v3 }
 0x12e   : > { %v3527_v47 = vadd.f32 1.0, %v2440_v44  ;;  %v435_v48 = vpop.f32.mrf.mxu0  ;;  %v970_v53 = vor.u32 1.1754944e-38, %v969_v26  ;;  %v736_v31 = vmul.f32 %v3488_v25, %v735_v39  ;;  %v1128_v55 = vpack.c.bf16 %v1100_v2, %v1099_v63 }
 0x12f   : > { %2445 = vpow2.f32 %v2181_v46  ;;  %vm968_vm15 = vcmp.eq.f32.partialorder %v967_v33, 8.507059e+37  ;;  %vm738_vm0 = vweird.f32 %v3447_v51  ;;  %v975_v58 = vsub.f32 1.0, %v974_v41 }
 0x130   : > { %v2442_v56 = vpop.eup %2441  ;;  %2447 = vrcp.f32 %v3527_v47  ;;  %v1115_v54 = vmul.f32 %v956_v37, %v3235_v34  ;;  %v971_v4 = vsel %vm968_vm15, %v970_v53, %v966_v43  ;;  %vm739_vm1 = vweird.f32 %v3488_v25  ;;  %1232 = vmatmul.bf16.gmra.mxu1 %v1128_v55 }
 0x131   : > { %v749_v16 = vmul.f32 %v2442_v56, %v3485_v40  ;;  %vm3539_vm2 = vcmp.eq.f32.partialorder %v742_v38, 8.507059e+37  ;;  %v744_v6 = vand.u32 2147483648, %v3447_v51  ;;  %2449 = vpow2.f32 %v2166_v14  ;;  %vm3552_vm4 = vmor %vm738_vm0, %vm739_vm1 }
 0x132   : > { %v2444_v62 = vpop.eup %2443  ;;  %v2182_v8 = vmul.f32 -1.442695, %v3531_v5  ;;  %v737_v9 = vadd.f32 %v3488_v25, %v736_v31  ;;  %vm978_vm3 = vweird.f32 %v3451_v61  ;;  %v982_v34 = vand.u32 2147483647, %v3451_v61 }
 0x133   : > { %v750_v10 = vsub.f32 1.0, %v749_v16  ;;  %v757_v21 = vand.u32 2147483647, %v3485_v40  ;;  %v1116_v11 = vmul.f32 %v971_v4, %v3308_v13  ;;  %v976_v7 = vmul.f32 %v3497_v30, %v975_v58 }
 0x134   : > { %v759_v0 = vand.u32 2147483648, %v3485_v40  ;;  %v3558_v15 = vadd.f32 1.0, %v2444_v62  ;;  %vm754_vm5 = vweird.f32 %v2442_v56  ;;  %2451 = vpow2.f32 %v2182_v8  ;;  %v475_v50 = vpop.f32.mrf.mxu2 }
 0x135   : > { %v2446_v17 = vpop.eup %2445  ;;  %v751_v24 = vmul.f32 %v2442_v56, %v750_v10  ;;  %v3561_v12 = vadd.f32 %v3001_v60, %v435_v48  ;;  %v745_v51 = vor.u32 1.1754944e-38, %v744_v6  ;;  %v984_v20 = vand.u32 2147483648, %v3451_v61  ;;  %v3637_v10 = vld [vmem:[%s4532_s2] ss:$0 sm:$0xff] }
 0x136   : > { %v3563_v13 = vpop.eup %2447  ;;  %vm753_vm6 = vweird.f32 %v3485_v40  ;;  %2453 = vrcp.f32 %v3558_v15  ;;  %v741_v22 = vsel %vm3552_vm4, %v3488_v25, %v737_v9  ;;  %v3573_v27 = vadd.f32 1.0, %v2446_v17  ;;  %v437_v33 = vpop.f32.mrf.mxu0 }
 0x137   : > { %v752_v23 = vadd.f32 %v2442_v56, %v751_v24  ;;  %v989_v18 = vmul.f32 %v3563_v13, %v3527_v47  ;;  %v2450_v28 = vpop.eup %2449  ;;  %vm979_vm7 = vweird.f32 %v3497_v30  ;;  %vm755_vm8 = vmor %vm753_vm6, %vm754_vm5  ;;  %v760_v32 = vor.u32 1.1754944e-38, %v759_v0 }
 0x138   : > { %v2167_v40 = vmul.f32 -1.442695, %v3561_v12  ;;  %v1136_v2 = vpack.c.bf16 %v1116_v11, %v1115_v54  ;;  %v977_v26 = vadd.f32 %v3497_v30, %v976_v7  ;;  %vm758_vm9 = vcmp.eq.f32.partialorder %v757_v21, 8.507059e+37  ;;  %vm3595_vm10 = vmor %vm978_vm3, %vm979_vm7 }
 0x139   : > { %v756_v25 = vsel %vm755_vm8, %v2442_v56, %v752_v23  ;;  %v990_v3 = vsub.f32 1.0, %v989_v18  ;;  %v746_v36 = vsel %vm3539_vm2, %v745_v51, %v741_v22  ;;  %2455 = vrcp.f32 %v3573_v27 }
 0x13a   : > { %v761_v39 = vsel %vm758_vm9, %v760_v32, %v756_v25  ;;  %v3582_v41 = vadd.f32 1.0, %v2450_v28  ;;  %v2452_v44 = vpop.eup %2451  ;;  %2457 = vpow2.f32 %v2167_v40  ;;  %1272 = vmatmul.bf16.gmra.mxu3 %v1136_v2  ;;  %v3587_v45 = vadd.f32 %v3001_v60, %v475_v50 }
 0x13b   : > { %v1102_v63 = vmul.f32 %v761_v39, %v3385_v19  ;;  %v991_v37 = vmul.f32 %v3563_v13, %v990_v3  ;;  %v997_v43 = vand.u32 2147483647, %v3527_v47  ;;  %v999_v19 = vand.u32 2147483648, %v3527_v47 }
 0x13c   : > { %v3589_v38 = vpop.eup %2453  ;;  %2459 = vrcp.f32 %v3582_v41  ;;  %v1101_v14 = vmul.f32 %v746_v36, %v3338_v57  ;;  %v981_v60 = vsel %vm3595_vm10, %v3497_v30, %v977_v26  ;;  %vm983_vm11 = vcmp.eq.f32.partialorder %v982_v34, 8.507059e+37  ;;  %v477_v8 = vpop.f32.mrf.mxu2 }
 0x13d   : > { %v764_v48 = vmul.f32 %v3589_v38, %v3558_v15  ;;  %v985_v61 = vor.u32 1.1754944e-38, %v984_v20  ;;  %vm994_vm12 = vweird.f32 %v3563_v13  ;;  %v3609_v53 = vadd.f32 1.0, %v2452_v44 }
 0x13e   : > { %v992_v31 = vadd.f32 %v3563_v13, %v991_v37  ;;  %v2183_v56 = vmul.f32 -1.442695, %v3587_v45  ;;  %v1129_v58 = vpack.c.bf16 %v1102_v63, %v1101_v14  ;;  %vm993_vm13 = vweird.f32 %v3527_v47  ;;  %v440_v11 = vpop.f32.mrf.mxu0 }
 0x13f   : > { %v765_v55 = vsub.f32 1.0, %v764_v48  ;;  %v3613_v57 = vpop.eup %2455  ;;  %v986_v54 = vsel %vm983_vm11, %v985_v61, %v981_v60  ;;  %vm3616_vm14 = vcmp.eq.f32.partialorder %v997_v43, 8.507059e+37  ;;  %v1000_v4 = vor.u32 1.1754944e-38, %v999_v19  ;;  %vm3626_vm15 = vmor %vm993_vm13, %vm994_vm12 }
 0x140   : > { %v2458_v16 = vpop.eup %2457  ;;  %v772_v29 = vand.u32 2147483647, %v3558_v15  ;;  %v774_v6 = vand.u32 2147483648, %v3558_v15  ;;  %2461 = vrcp.f32 %v3609_v53  ;;  %1237 = vmatmul.bf16.gmra.mxu1 %v1129_v58  ;;  %vm768_vm0 = vweird.f32 %v3558_v15 }
 0x141   : > { %v766_v62 = vmul.f32 %v3589_v38, %v765_v55  ;;  %vm769_vm1 = vweird.f32 %v3589_v38  ;;  %v3632_v34 = vadd.f32 1.0, %v2458_v16  ;;  %v3640_v21 = vadd.f32 %v3637_v10, %v437_v33 }
 0x142   : > { %v2460_v9 = vpop.eup %2459  ;;  %v996_v59 = vsel %vm3626_vm15, %v3563_v13, %v992_v31  ;;  %v1004_v7 = vmul.f32 %v3613_v57, %v3573_v27  ;;  %2463 = vpow2.f32 %v2183_v56  ;;  %v1117_v17 = vmul.f32 %v986_v54, %v3365_v35  ;;  %vm3663_vm3 = vmor %vm768_vm0, %vm769_vm1 }
 0x143   : > { %v779_v0 = vmul.f32 %v2460_v9, %v3582_v41  ;;  %v787_v24 = vand.u32 2147483647, %v3582_v41  ;;  %v789_v51 = vand.u32 2147483648, %v3582_v41  ;;  %2465 = vrcp.f32 %v3632_v34 }
 0x144   : > { %v767_v20 = vadd.f32 %v3589_v38, %v766_v62  ;;  %vm3653_vm2 = vcmp.eq.f32.partialorder %v772_v29, 8.507059e+37  ;;  %v775_v13 = vor.u32 1.1754944e-38, %v774_v6  ;;  %v1001_v18 = vsel %vm3616_vm14, %v1000_v4, %v996_v59  ;;  %v480_v48 = vpop.f32.mrf.mxu2 }
 0x145   : > { %v780_v23 = vsub.f32 1.0, %v779_v0  ;;  %v1014_v50 = vand.u32 2147483648, %v3573_v27  ;;  %vm783_vm4 = vweird.f32 %v3582_v41  ;;  %v2168_v28 = vmul.f32 -1.442695, %v3640_v21 }
 0x146   : > { %v3670_v32 = vpop.eup %2461  ;;  %v1005_v40 = vsub.f32 1.0, %v1004_v7  ;;  %vm784_vm5 = vweird.f32 %v2460_v9  ;;  %v3673_v33 = vadd.f32 %v3637_v10, %v477_v8  ;;  %vm1009_vm6 = vweird.f32 %v3613_v57  ;;  %v442_v31 = vpop.f32.mrf.mxu0 }
 0x147   : > { %v781_v2 = vmul.f32 %v2460_v9, %v780_v23  ;;  %vm3676_vm7 = vcmp.eq.f32.partialorder %v787_v24, 8.507059e+37  ;;  %v790_v26 = vor.u32 1.1754944e-38, %v789_v51  ;;  %v1019_v25 = vmul.f32 %v3670_v32, %v3609_v53  ;;  %vm785_vm8 = vmor %vm783_vm4, %vm784_vm5 }
 0x148   : > { %v2464_v3 = vpop.eup %2463  ;;  %v771_v36 = vsel %vm3663_vm3, %v3589_v38, %v767_v20  ;;  %2467 = vpow2.f32 %v2168_v28  ;;  %v2184_v44 = vmul.f32 -1.442695, %v3673_v33  ;;  %v1118_v37 = vmul.f32 %v1001_v18, %v3434_v1 }
 0x149   : > { %v782_v39 = vadd.f32 %v2460_v9, %v781_v2  ;;  %v3686_v63 = vpop.eup %2465  ;;  %v1020_v46 = vsub.f32 1.0, %v1019_v25  ;;  %v3691_v43 = vadd.f32 1.0, %v2464_v3  ;;  %v3694_v19 = vadd.f32 %v3637_v10, %v440_v11 }
 0x14a   : > { %v1006_v14 = vmul.f32 %v3613_v57, %v1005_v40  ;;  %v794_v60 = vmul.f32 %v3686_v63, %v3632_v34  ;;  %2469 = vpow2.f32 %v2184_v44  ;;  %v776_v1 = vsel %vm3653_vm2, %v775_v13, %v771_v36 }
 0x14b   : > { %v786_v38 = vsel %vm785_vm8, %v2460_v9, %v782_v39  ;;  %v1021_v61 = vmul.f32 %v3670_v32, %v1020_v46  ;;  %2471 = vrcp.f32 %v3691_v43  ;;  %vm1023_vm9 = vweird.f32 %v3609_v53 }
 0x14c   : > { %v791_v41 = vsel %vm3676_vm7, %v790_v26, %v786_v38  ;;  %vm1024_vm10 = vweird.f32 %v3670_v32  ;;  %v1027_v56 = vand.u32 2147483647, %v3609_v53  ;;  %v2169_v54 = vmul.f32 -1.442695, %v3694_v19  ;;  %v482_v26 = vpop.f32.mrf.mxu2 }
 0x14d   : > { %v1104_v55 = vmul.f32 %v791_v41, %v3504_v49  ;;  %v1022_v58 = vadd.f32 %v3670_v32, %v1021_v61  ;;  %v1137_v30 = vpack.c.bf16 %v1118_v37, %v1117_v17  ;;  %v3712_v4 = vadd.f32 %v3637_v10, %v480_v48  ;;  %vm3729_vm12 = vmor %vm1023_vm9, %vm1024_vm10 }
 0x14e   : > { %v2468_v16 = vpop.eup %2467  ;;  %v1103_v62 = vmul.f32 %v776_v1, %v3462_v52  ;;  %v1029_v29 = vand.u32 2147483648, %v3609_v53  ;;  %v795_v49 = vsub.f32 1.0, %v794_v60  ;;  %v3717_v6 = vadd.f32 %v3637_v10, %v442_v31 }
 0x14f   : > { %v1007_v8 = vadd.f32 %v3613_v57, %v1006_v14  ;;  %v3720_v9 = vadd.f32 1.0, %v2468_v16  ;;  %2473 = vpow2.f32 %v2169_v54  ;;  %1277 = vmatmul.bf16.gmra.mxu3 %v1137_v30  ;;  %v2185_v47 = vmul.f32 -1.442695, %v3712_v4 }
 0x150   : > { %v2470_v11 = vpop.eup %2469  ;;  %vm1008_vm11 = vweird.f32 %v3573_v27  ;;  %v1012_v59 = vand.u32 2147483647, %v3573_v27  ;;  %v2170_v7 = vmul.f32 -1.442695, %v3717_v6  ;;  %v1130_v0 = vpack.c.bf16 %v1104_v55, %v1103_v62 }
 0x151   : > { %v3734_v17 = vpop.eup %2471  ;;  %v1015_v24 = vor.u32 1.1754944e-38, %v1014_v50  ;;  %v1026_v51 = vsel %vm3729_vm12, %v3670_v32, %v1022_v58  ;;  %vm1028_vm13 = vcmp.eq.f32.partialorder %v1027_v56, 8.507059e+37  ;;  %2475 = vrcp.f32 %v3720_v9  ;;  %vm3742_vm14 = vmor %vm1008_vm11, %vm1009_vm6 }
 0x152   : > { %v1030_v53 = vor.u32 1.1754944e-38, %v1029_v29  ;;  %v796_v20 = vmul.f32 %v3686_v63, %v795_v49  ;;  %vm798_vm15 = vweird.f32 %v3632_v34  ;;  %v1034_v22 = vmul.f32 %v3734_v17, %v3691_v43  ;;  %1242 = vmatmul.bf16.gmra.mxu1 %v1130_v0 }
 0x153   : > { %v1011_v13 = vsel %vm3742_vm14, %v3613_v57, %v1007_v8  ;;  %v802_v23 = vand.u32 2147483647, %v3632_v34  ;;  %v3754_v18 = vadd.f32 1.0, %v2470_v11  ;;  %2477 = vpow2.f32 %v2185_v47 }
 0x154   : > { %v1031_v35 = vsel %vm1028_vm13, %v1030_v53, %v1026_v51  ;;  %vm799_vm0 = vweird.f32 %v3686_v63  ;;  %v804_v50 = vand.u32 2147483648, %v3632_v34  ;;  %2479 = vpow2.f32 %v2170_v7 }
 0x155   : > { %v2474_v28 = vpop.eup %2473  ;;  %vm1013_vm1 = vcmp.eq.f32.partialorder %v1012_v59, 8.507059e+37  ;;  %v1044_v32 = vand.u32 2147483648, %v3691_v43  ;;  %2481 = vrcp.f32 %v3754_v18  ;;  %v797_v57 = vadd.f32 %v3686_v63, %v796_v20  ;;  %vm3766_vm2 = vmor %vm798_vm15, %vm799_vm0 }
 0x156   : > { %v1016_v40 = vsel %vm1013_vm1, %v1015_v24, %v1011_v13  ;;  %v1035_v2 = vsub.f32 1.0, %v1034_v22  ;;  %v3761_v15 = vadd.f32 1.0, %v2474_v28  ;;  %v1120_v3 = vmul.f32 %v1031_v35, %v3531_v5 }
 0x157   : > { %v2476_v25 = vpop.eup %2475  ;;  %vm3770_vm3 = vcmp.eq.f32.partialorder %v802_v23, 8.507059e+37  ;;  %v805_v44 = vor.u32 1.1754944e-38, %v804_v50  ;;  %v1042_v37 = vand.u32 2147483647, %v3691_v43  ;;  %v1119_v5 = vmul.f32 %v1016_v40, %v3495_v42 }
 0x158   : > { %v809_v46 = vmul.f32 %v2476_v25, %v3720_v9  ;;  %2483 = vrcp.f32 %v3761_v15  ;;  %vm1038_vm4 = vweird.f32 %v3691_v43  ;;  %v1045_v34 = vor.u32 1.1754944e-38, %v1044_v32 }
 0x159   : > { %v2478_v14 = vpop.eup %2477  ;;  %v3780_v38 = vadd.f32 %v3637_v10, %v482_v26  ;;  %v801_v48 = vsel %vm3766_vm2, %v3686_v63, %v797_v57  ;;  %v1036_v1 = vmul.f32 %v3734_v17, %v1035_v2  ;;  %vm813_vm5 = vweird.f32 %v3720_v9 }
 0x15a   : > { %v2480_v60 = vpop.eup %2479  ;;  %v810_v41 = vsub.f32 1.0, %v809_v46  ;;  %v3786_v61 = vadd.f32 1.0, %v2478_v14  ;;  %v819_v42 = vand.u32 2147483648, %v3720_v9  ;;  %v1138_v56 = vpack.c.bf16 %v1120_v3, %v1119_v5 }
 0x15b   : > { %v2482_v31 = vpop.eup %2481  ;;  %v3790_v55 = vadd.f32 1.0, %v2480_v60  ;;  %vm3792_vm6 = vcmp.eq.f32.partialorder %v1042_v37, 8.507059e+37  ;;  %vm814_vm7 = vweird.f32 %v2476_v25  ;;  %v817_v63 = vand.u32 2147483647, %v3720_v9 }
 0x15c   : > { %v811_v58 = vmul.f32 %v2476_v25, %v810_v41  ;;  %v1049_v54 = vmul.f32 %v2482_v31, %v3754_v18  ;;  %v806_v30 = vsel %vm3770_vm3, %v805_v44, %v801_v48  ;;  %vm1039_vm8 = vweird.f32 %v3734_v17  ;;  %vm815_vm9 = vmor %vm813_vm5, %vm814_vm7 }
 0x15d   : > { %2485 = vrcp.f32 %v3786_v61  ;;  %v2186_v16 = vmul.f32 -1.442695, %v3780_v38  ;;  %v1037_v29 = vadd.f32 %v3734_v17, %v1036_v1  ;;  %v820_v47 = vor.u32 1.1754944e-38, %v819_v42  ;;  %vm3818_vm12 = vmor %vm1038_vm4, %vm1039_vm8 }
 0x15e   : > { %v3803_v62 = vpop.eup %2483  ;;  %v812_v49 = vadd.f32 %v2476_v25, %v811_v58  ;;  %v1050_v8 = vsub.f32 1.0, %v1049_v54  ;;  %2487 = vrcp.f32 %v3790_v55  ;;  %v1057_v11 = vand.u32 2147483647, %v3754_v18 }
 0x15f   : > { %v1059_v59 = vand.u32 2147483648, %v3754_v18  ;;  %v824_v52 = vmul.f32 %v3803_v62, %v3761_v15  ;;  %1282 = vmatmul.bf16.gmra.mxu3 %v1138_v56  ;;  %vm818_vm10 = vcmp.eq.f32.partialorder %v817_v63, 8.507059e+37  ;;  %vm1054_vm11 = vweird.f32 %v2482_v31 }
 0x160   : > { %v816_v7 = vsel %vm815_vm9, %v2476_v25, %v812_v49  ;;  %v1051_v0 = vmul.f32 %v2482_v31, %v1050_v8  ;;  %v1105_v24 = vmul.f32 %v806_v30, %v3561_v12  ;;  %2489 = vpow2.f32 %v2186_v16 }
 0x161   : > { %v821_v51 = vsel %vm818_vm10, %v820_v47, %v816_v7  ;;  %v825_v27 = vsub.f32 1.0, %v824_v52  ;;  %v1041_v53 = vsel %vm3818_vm12, %v3734_v17, %v1037_v29  ;;  %vm1053_vm13 = vweird.f32 %v3754_v18 }
 0x162   : > { %v1106_v20 = vmul.f32 %v821_v51, %v3640_v21  ;;  %v1052_v22 = vadd.f32 %v2482_v31, %v1051_v0  ;;  %vm1055_vm14 = vmor %vm1053_vm13, %vm1054_vm11  ;;  %vm1058_vm15 = vcmp.eq.f32.partialorder %v1057_v11, 8.507059e+37  ;;  %v1060_v43 = vor.u32 1.1754944e-38, %v1059_v59 }
 0x163   : > { %v3827_v12 = vpop.eup %2485  ;;  %v826_v13 = vmul.f32 %v3803_v62, %v825_v27  ;;  %vm828_vm0 = vweird.f32 %v3761_v15  ;;  %vm829_vm1 = vweird.f32 %v3803_v62  ;;  %v834_v17 = vand.u32 2147483648, %v3761_v15 }
 0x164   : > { %v2488_v23 = vpop.eup %2487  ;;  %v1056_v35 = vsel %vm1055_vm14, %v2482_v31, %v1052_v22  ;;  %v1131_v50 = vpack.c.bf16 %v1106_v20, %v1105_v24  ;;  %v1046_v21 = vsel %vm3792_vm6, %v1045_v34, %v1041_v53  ;;  %v1064_v28 = vmul.f32 %v3827_v12, %v3786_v61  ;;  %vm3843_vm2 = vmor %vm828_vm0, %vm829_vm1 }
 0x165   : > { %v1061_v18 = vsel %vm1058_vm15, %v1060_v43, %v1056_v35  ;;  %v839_v32 = vmul.f32 %v2488_v23, %v3790_v55  ;;  %v827_v40 = vadd.f32 %v3803_v62, %v826_v13  ;;  %v832_v57 = vand.u32 2147483647, %v3761_v15 }
 0x166   : > { %1247 = vmatmul.bf16.gmra.mxu1 %v1131_v50  ;;  %v2490_v2 = vpop.eup %2489  ;;  %v1122_v26 = vmul.f32 %v1061_v18, %v3673_v33  ;;  %v1121_v36 = vmul.f32 %v1046_v21, %v3587_v45  ;;  %v835_v39 = vor.u32 1.1754944e-38, %v834_v17  ;;  %v849_v44 = vand.u32 2147483648, %v3790_v55 }
 0x167   : > { %v840_v3 = vsub.f32 1.0, %v839_v32  ;;  %v612_v37 = vadd.f32 1.0, %v2490_v2  ;;  %v1065_v46 = vsub.f32 1.0, %v1064_v28  ;;  %vm844_vm3 = vweird.f32 %v2488_v23 }
 0x168   : > { %v847_v5 = vand.u32 2147483647, %v3790_v55  ;;  %v831_v33 = vsel %vm3843_vm2, %v3803_v62, %v827_v40  ;;  %vm833_vm4 = vcmp.eq.f32.partialorder %v832_v57, 8.507059e+37  ;;  %vm843_vm5 = vweird.f32 %v3790_v55 }
 0x169   : > { %v841_v14 = vmul.f32 %v2488_v23, %v840_v3  ;;  %2491 = vrcp.f32 %v612_v37  ;;  %v1139_v34 = vpack.c.bf16 %v1122_v26, %v1121_v36  ;;  %vm845_vm6 = vmor %vm843_vm5, %vm844_vm3  ;;  %v850_v45 = vor.u32 1.1754944e-38, %v849_v44 }
 0x16a   : > { %v836_v60 = vsel %vm833_vm4, %v835_v39, %v831_v33  ;;  %v1066_v48 = vmul.f32 %v3827_v12, %v1065_v46  ;;  %vm848_vm7 = vcmp.eq.f32.partialorder %v847_v5, 8.507059e+37  ;;  %vm1069_vm8 = vweird.f32 %v3827_v12 }
 0x16b   : > { %v842_v15 = vadd.f32 %v2488_v23, %v841_v14  ;;  %v1107_v56 = vmul.f32 %v836_v60, %v3694_v19  ;;  %v1074_v58 = vand.u32 2147483648, %v3786_v61  ;;  %vm1068_vm9 = vweird.f32 %v3786_v61 }
 0x16c   : > { %v1067_v10 = vadd.f32 %v3827_v12, %v1066_v48  ;;  %v1072_v54 = vand.u32 2147483647, %v3786_v61  ;;  %vm1070_vm10 = vmor %vm1068_vm9, %vm1069_vm8  ;;  %v1089_v16 = vand.u32 2147483648, %v612_v37  ;;  %v1087_v19 = vand.u32 2147483647, %v612_v37 }
 0x16d   : > { %v846_v1 = vsel %vm845_vm6, %v2488_v23, %v842_v15  ;;  %v1075_v29 = vor.u32 1.1754944e-38, %v1074_v58  ;;  %vm1083_vm13 = vweird.f32 %v612_v37  ;;  %v3866_v61 = vld [vmem:[%s4534_s4] ss:$0 sm:$0xff] }
 0x16e   : > { %v851_v41 = vsel %vm848_vm7, %v850_v45, %v846_v1  ;;  %vm1073_vm12 = vcmp.eq.f32.partialorder %v1072_v54, 8.507059e+37  ;;  %v1090_v47 = vor.u32 1.1754944e-38, %v1089_v16  ;;  %vm1088_vm15 = vcmp.eq.f32.partialorder %v1087_v19, 8.507059e+37  ;;  %v2622_v19 = vld [vmem:[%s2956_s16] sm:$0xff] }
 0x16f   : > { %v1108_v31 = vmul.f32 %v851_v41, %v3717_v6  ;;  %1287 = vmatmul.bf16.gmra.mxu3 %v1139_v34  ;;  %v2492_v42 = vpop.eup %2491  ;;  %v1071_v6 = vsel %vm1070_vm10, %v3827_v12, %v1067_v10 }
 0x170   : > { %v1079_v55 = vmul.f32 %v2492_v42, %v612_v37  ;;  %vm1084_vm11 = vweird.f32 %v2492_v42  ;;  %v1076_v8 = vsel %vm1073_vm12, %v1075_v29, %v1071_v6 }
 0x171   : > { %v1132_v63 = vpack.c.bf16 %v1108_v31, %v1107_v56  ;;  %vm1085_vm14 = vmor %vm1083_vm13, %vm1084_vm11  ;;  %v1123_v52 = vmul.f32 %v1076_v8, %v3712_v4 }
 0x172   : > { %v1080_v30 = vsub.f32 1.0, %v1079_v55 }
 0x174   : > { %v1081_v62 = vmul.f32 %v2492_v42, %v1080_v30 }
 0x176   : > { %1252 = vmatmul.bf16.gmra.mxu1 %v1132_v63  ;;  %v1082_v49 = vadd.f32 %v2492_v42, %v1081_v62 }
 0x178   : > { %v1086_v11 = vsel %vm1085_vm14, %v2492_v42, %v1082_v49  ;;  %v1218_v0 = vpop.f32.mrf.mxu1 }
 0x179   : > { %v1091_v59 = vsel %vm1088_vm15, %v1090_v47, %v1086_v11  ;;  %v1219_v24 = vadd.f32 %v3866_v61, %v1218_v0 }
 0x17a   : > { %v1124_v7 = vmul.f32 %v1091_v59, %v3780_v38 }
 0x17b   : > { %v2219_v51 = vmul.f32 -1.442695, %v1219_v24 }
 0x17c   : > { %v1140_v9 = vpack.c.bf16 %v1124_v7, %v1123_v52 }
 0x17d   : > { %2493 = vpow2.f32 %v2219_v51 }
 0x17f   : > { %1292 = vmatmul.bf16.gmra.mxu3 %v1140_v9 }
 0x180   : > { %v1220_v27 = vpop.f32.mrf.mxu1 }
 0x181   : > { %v3872_v53 = vadd.f32 %v3866_v61, %v1220_v27 }
 0x183   : > { %v1258_v20 = vpop.f32.mrf.mxu3  ;;  %v2494_v22 = vpop.eup %2493  ;;  %v2220_v12 = vmul.f32 -1.442695, %v3872_v53 }
 0x184   : > { %v3876_v43 = vadd.f32 %v3866_v61, %v1258_v20  ;;  %v1394_v4 = vadd.f32 1.0, %v2494_v22 }
 0x185   : > { %2495 = vpow2.f32 %v2220_v12 }
 0x186   : > { %v2235_v38 = vmul.f32 -1.442695, %v3876_v43  ;;  %2497 = vrcp.f32 %v1394_v4  ;;  %v1437_v25 = vand.u32 2147483648, %v1394_v4  ;;  %v1435_v39 = vand.u32 2147483647, %v1394_v4 }
 0x187   : > { %vm1431_vm1 = vweird.f32 %v1394_v4 }
 0x188   : > { %2499 = vpow2.f32 %v2235_v38  ;;  %v1438_v15 = vor.u32 1.1754944e-38, %v1437_v25  ;;  %vm1436_vm3 = vcmp.eq.f32.partialorder %v1435_v39, 8.507059e+37 }
 0x189   : > { %v1223_v13 = vpop.f32.mrf.mxu1 }
 0x18a   : > { %v3880_v23 = vadd.f32 %v3866_v61, %v1223_v13 }
 0x18b   : > { %v1260_v35 = vpop.f32.mrf.mxu3  ;;  %v2496_v17 = vpop.eup %2495 }
 0x18c   : > { %v2221_v50 = vmul.f32 -1.442695, %v3880_v23  ;;  %v3884_v21 = vadd.f32 %v3866_v61, %v1260_v35  ;;  %v2498_v18 = vpop.eup %2497  ;;  %v3886_v28 = vadd.f32 1.0, %v2496_v17 }
 0x18d   : > { %v1427_v40 = vmul.f32 %v2498_v18, %v1394_v4  ;;  %vm1432_vm0 = vweird.f32 %v2498_v18 }
 0x18e   : > { %v2500_v32 = vpop.eup %2499  ;;  %2501 = vpow2.f32 %v2221_v50  ;;  %v2236_v57 = vmul.f32 -1.442695, %v3884_v21  ;;  %vm1433_vm2 = vmor %vm1431_vm1, %vm1432_vm0  ;;  %v1450_v34 = vand.u32 2147483647, %v3886_v28  ;;  %vm1446_vm4 = vweird.f32 %v3886_v28 }
 0x18f   : > { %2503 = vrcp.f32 %v3886_v28  ;;  %v1428_v2 = vsub.f32 1.0, %v1427_v40  ;;  %v3890_v26 = vadd.f32 1.0, %v2500_v32  ;;  %v1452_v42 = vand.u32 2147483648, %v3886_v28 }
 0x190   : > { %2505 = vpow2.f32 %v2236_v57  ;;  %vm3911_vm5 = vcmp.eq.f32.partialorder %v1450_v34, 8.507059e+37 }
 0x191   : > { %v1225_v3 = vpop.f32.mrf.mxu1  ;;  %v1429_v36 = vmul.f32 %v2498_v18, %v1428_v2  ;;  %2507 = vrcp.f32 %v3890_v26  ;;  %v1675_v56 = vand.u32 2147483647, %v3890_v26  ;;  %v1677_v6 = vand.u32 2147483648, %v3890_v26 }
 0x192   : > { %v3894_v44 = vadd.f32 %v3866_v61, %v1225_v3  ;;  %v1453_v8 = vor.u32 1.1754944e-38, %v1452_v42  ;;  %vm1671_vm7 = vweird.f32 %v3890_v26 }
 0x193   : > { %v1430_v14 = vadd.f32 %v2498_v18, %v1429_v36  ;;  %vm3920_vm8 = vcmp.eq.f32.partialorder %v1675_v56, 8.507059e+37  ;;  %v1678_v51 = vor.u32 1.1754944e-38, %v1677_v6  ;;  %v2623_v36 = vld [vmem:[%s2956_s16 + $0x8] sm:$0xff] }
 0x194   : > { %v2502_v46 = vpop.eup %2501  ;;  %v2222_v60 = vmul.f32 -1.442695, %v3894_v44 }
 0x195   : > { %v1263_v37 = vpop.f32.mrf.mxu3  ;;  %v2504_v33 = vpop.eup %2503  ;;  %v3900_v45 = vadd.f32 1.0, %v2502_v46  ;;  %v1434_v1 = vsel %vm1433_vm2, %v2498_v18, %v1430_v14 }
 0x196   : > { %v3897_v5 = vadd.f32 %v3866_v61, %v1263_v37  ;;  %v2506_v48 = vpop.eup %2505  ;;  %v1442_v41 = vmul.f32 %v2504_v33, %v3886_v28  ;;  %v1439_v31 = vsel %vm1436_vm3, %v1438_v15, %v1434_v1  ;;  %vm1447_vm6 = vweird.f32 %v2504_v33 }
 0x197   : > { %2509 = vrcp.f32 %v3900_v45  ;;  %v2508_v10 = vpop.eup %2507  ;;  %v1906_v55 = vmul.f32 %v1439_v31, %v1219_v24  ;;  %v3908_v63 = vadd.f32 1.0, %v2506_v48  ;;  %vm1448_vm9 = vmor %vm1446_vm4, %vm1447_vm6  ;;  %v1465_v27 = vand.u32 2147483647, %v3900_v45 }
 0x198   : > { %v1443_v58 = vsub.f32 1.0, %v1442_v41  ;;  %v2237_v54 = vmul.f32 -1.442695, %v3897_v5  ;;  %v1667_v16 = vmul.f32 %v2508_v10, %v3890_v26  ;;  %2511 = vpow2.f32 %v2222_v60  ;;  %v2624_v60 = vld [vmem:[%s2956_s16 + $0x80] sm:$0xff] }
 0x199   : > { %v1938_v29 = vadd.f32 %v2622_v19, %v1906_v55  ;;  %2513 = vrcp.f32 %v3908_v63  ;;  %vm1672_vm10 = vweird.f32 %v2508_v10  ;;  %v1467_v12 = vand.u32 2147483648, %v3900_v45 }
 0x19a   : > { %v1444_v49 = vmul.f32 %v2504_v33, %v1443_v58  ;;  %v1668_v47 = vsub.f32 1.0, %v1667_v16  ;;  %2515 = vpow2.f32 %v2237_v54  ;;  %v1692_v17 = vand.u32 2147483648, %v3908_v63  ;;  %vm1673_vm11 = vmor %vm1671_vm7, %vm1672_vm10 }
 0x19b   : > { %1970 = vst [vmem:[%s3926_s27] sm:$0xff] %v1938_v29  ;;  %vm1461_vm13 = vweird.f32 %v3900_v45  ;;  %vm3958_vm14 = vcmp.eq.f32.partialorder %v1465_v27, 8.507059e+37  ;;  %v1468_v15 = vor.u32 1.1754944e-38, %v1467_v12  ;;  %vm1686_vm1 = vweird.f32 %v3908_v63 }
 0x19c   : > { %v1228_v62 = vpop.f32.mrf.mxu1  ;;  %v1445_v52 = vadd.f32 %v2504_v33, %v1444_v49  ;;  %v1669_v9 = vmul.f32 %v2508_v10, %v1668_v47  ;;  %v1693_v31 = vor.u32 1.1754944e-38, %v1692_v17  ;;  %v2625_v49 = vld [vmem:[%s2956_s16 + $0x10] sm:$0xff] }
 0x19d   : > { %v1265_v59 = vpop.f32.mrf.mxu3  ;;  %v3930_v7 = vadd.f32 %v3866_v61, %v1228_v62  ;;  %v2510_v24 = vpop.eup %2509 }
 0x19e   : > { %v3933_v0 = vadd.f32 %v3866_v61, %v1265_v59  ;;  %v1449_v20 = vsel %vm1448_vm9, %v2504_v33, %v1445_v52  ;;  %v1457_v22 = vmul.f32 %v2510_v24, %v3900_v45  ;;  %v2512_v38 = vpop.eup %2511  ;;  %v1670_v35 = vadd.f32 %v2508_v10, %v1669_v9 }
 0x19f   : > { %v2223_v4 = vmul.f32 -1.442695, %v3930_v7  ;;  %v1454_v13 = vsel %vm3911_vm5, %v1453_v8, %v1449_v20  ;;  %v2514_v18 = vpop.eup %2513  ;;  %v3948_v40 = vadd.f32 1.0, %v2512_v38  ;;  %vm1462_vm12 = vweird.f32 %v2510_v24 }
 0x1a0   : > { %v2238_v50 = vmul.f32 -1.442695, %v3933_v0  ;;  %v1907_v28 = vmul.f32 %v1454_v13, %v3872_v53  ;;  %v1458_v32 = vsub.f32 1.0, %v1457_v22  ;;  %v1674_v57 = vsel %vm1673_vm11, %v2508_v10, %v1670_v35  ;;  %v2516_v3 = vpop.eup %2515  ;;  %vm1463_vm15 = vmor %vm1461_vm13, %vm1462_vm12  ;;  %v2626_v22 = vld [vmem:[%s2956_s16 + $0x88] sm:$0xff] }
 0x1a1   : > { %2517 = vpow2.f32 %v2223_v4  ;;  %v1682_v2 = vmul.f32 %v2514_v18, %v3908_v63  ;;  %v1679_v53 = vsel %vm3920_vm8, %v1678_v51, %v1674_v57  ;;  %v3962_v34 = vadd.f32 1.0, %v2516_v3 }
 0x1a2   : > { %2519 = vpow2.f32 %v2238_v50  ;;  %v1939_v39 = vadd.f32 %v2623_v36, %v1907_v28  ;;  %v1459_v26 = vmul.f32 %v2510_v24, %v1458_v32  ;;  %v1922_v37 = vmul.f32 %v1679_v53, %v3876_v43 }
 0x1a3   : > { %2521 = vrcp.f32 %v3948_v40  ;;  %v1683_v46 = vsub.f32 1.0, %v1682_v2  ;;  %vm1687_vm0 = vweird.f32 %v2514_v18  ;;  %v1690_v43 = vand.u32 2147483647, %v3908_v63 }
 0x1a4   : > { %v1230_v25 = vpop.f32.mrf.mxu1  ;;  %1971 = vst [vmem:[%s3926_s27 + $0x8] sm:$0xff] %v1939_v39  ;;  %v1460_v14 = vadd.f32 %v2510_v24, %v1459_v26  ;;  %v1954_v48 = vadd.f32 %v2624_v60, %v1922_v37  ;;  %2523 = vrcp.f32 %v3962_v34  ;;  %v1480_v55 = vand.u32 2147483647, %v3948_v40  ;;  %vm1688_vm2 = vmor %vm1686_vm1, %vm1687_vm0 }
 0x1a5   : > { %v1684_v1 = vmul.f32 %v2514_v18, %v1683_v46  ;;  %v3974_v58 = vadd.f32 %v3866_v61, %v1230_v25  ;;  %v1482_v63 = vand.u32 2147483648, %v3948_v40  ;;  %vm1691_vm3 = vcmp.eq.f32.partialorder %v1690_v43, 8.507059e+37 }
 0x1a6   : > { %v1464_v41 = vsel %vm1463_vm15, %v2510_v24, %v1460_v14  ;;  %1986 = vst [vmem:[%s3926_s27 + $0x80] sm:$0xff] %v1954_v48  ;;  %v1705_v29 = vand.u32 2147483647, %v3962_v34  ;;  %vm1476_vm4 = vweird.f32 %v3948_v40  ;;  %vm3992_vm5 = vcmp.eq.f32.partialorder %v1480_v55, 8.507059e+37 }
 0x1a7   : > { %v2518_v45 = vpop.eup %2517  ;;  %v1469_v56 = vsel %vm3958_vm14, %v1468_v15, %v1464_v41  ;;  %v1685_v10 = vadd.f32 %v2514_v18, %v1684_v1  ;;  %v2224_v52 = vmul.f32 -1.442695, %v3974_v58  ;;  %v1483_v20 = vor.u32 1.1754944e-38, %v1482_v63 }
 0x1a8   : > { %v2520_v42 = vpop.eup %2519  ;;  %v1908_v30 = vmul.f32 %v1469_v56, %v3880_v23  ;;  %v3979_v16 = vadd.f32 1.0, %v2518_v45  ;;  %v1707_v23 = vand.u32 2147483648, %v3962_v34  ;;  %vm1701_vm7 = vweird.f32 %v3962_v34  ;;  %v2627_v45 = vld [vmem:[%s2956_s16 + $0x18] sm:$0xff] }
 0x1a9   : > { %v2522_v54 = vpop.eup %2521  ;;  %v3981_v6 = vadd.f32 1.0, %v2520_v42  ;;  %v1689_v62 = vsel %vm1688_vm2, %v2514_v18, %v1685_v10  ;;  %vm4000_vm8 = vcmp.eq.f32.partialorder %v1705_v29, 8.507059e+37  ;;  %v2628_v29 = vld [vmem:[%s2956_s16 + $0x90] sm:$0xff] }
 0x1aa   : > { %v1472_v19 = vmul.f32 %v2522_v54, %v3948_v40  ;;  %v1940_v8 = vadd.f32 %v2625_v49, %v1908_v30  ;;  %v1694_v47 = vsel %vm1691_vm3, %v1693_v31, %v1689_v62  ;;  %2525 = vrcp.f32 %v3979_v16  ;;  %v2524_v51 = vpop.eup %2523 }
 0x1ab   : > { %v1923_v11 = vmul.f32 %v1694_v47, %v3884_v21  ;;  %2527 = vrcp.f32 %v3981_v6  ;;  %vm1477_vm6 = vweird.f32 %v2522_v54  ;;  %v1697_v4 = vmul.f32 %v2524_v51, %v3962_v34 }
 0x1ac   : > { %v1473_v59 = vsub.f32 1.0, %v1472_v19  ;;  %1972 = vst [vmem:[%s3926_s27 + $0x10] sm:$0xff] %v1940_v8  ;;  %v1708_v13 = vor.u32 1.1754944e-38, %v1707_v23  ;;  %v1495_v35 = vand.u32 2147483647, %v3979_v16  ;;  %vm1491_vm9 = vweird.f32 %v3979_v16  ;;  %vm1478_vm10 = vmor %vm1476_vm4, %vm1477_vm6 }
 0x1ad   : > { %v1268_v24 = vpop.f32.mrf.mxu3  ;;  %v1233_v9 = vpop.f32.mrf.mxu1  ;;  %v1955_v12 = vadd.f32 %v2626_v22, %v1923_v11  ;;  %v1698_v50 = vsub.f32 1.0, %v1697_v4  ;;  %2529 = vpow2.f32 %v2224_v52  ;;  %vm1702_vm11 = vweird.f32 %v2524_v51 }
 0x1ae   : > { %v1474_v21 = vmul.f32 %v2522_v54, %v1473_v59  ;;  %v4008_v18 = vadd.f32 %v3866_v61, %v1268_v24  ;;  %v1497_v32 = vand.u32 2147483648, %v3979_v16  ;;  %v1720_v57 = vand.u32 2147483647, %v3981_v6  ;;  %vm1703_vm13 = vmor %vm1701_vm7, %vm1702_vm11 }
 0x1af   : > { %1987 = vst [vmem:[%s3926_s27 + $0x88] sm:$0xff] %v1955_v12  ;;  %v4015_v2 = vadd.f32 %v3866_v61, %v1233_v9  ;;  %v1699_v3 = vmul.f32 %v2524_v51, %v1698_v50  ;;  %v1722_v39 = vand.u32 2147483648, %v3981_v6  ;;  %vm1496_vm0 = vcmp.eq.f32.partialorder %v1495_v35, 8.507059e+37 }
 0x1b0   : > { %v1475_v17 = vadd.f32 %v2522_v54, %v1474_v21  ;;  %v2526_v28 = vpop.eup %2525  ;;  %v2239_v40 = vmul.f32 -1.442695, %v4008_v18  ;;  %v1498_v19 = vor.u32 1.1754944e-38, %v1497_v32  ;;  %vm1716_vm1 = vweird.f32 %v3981_v6 }
 0x1b1   : > { %v1487_v36 = vmul.f32 %v2526_v28, %v3979_v16  ;;  %v2528_v53 = vpop.eup %2527  ;;  %vm1492_vm12 = vweird.f32 %v2526_v28  ;;  %v2225_v37 = vmul.f32 -1.442695, %v4015_v2  ;;  %v1700_v14 = vadd.f32 %v2524_v51, %v1699_v3 }
 0x1b2   : > { %v1479_v25 = vsel %vm1478_vm10, %v2522_v54, %v1475_v17  ;;  %v1712_v15 = vmul.f32 %v2528_v53, %v3981_v6  ;;  %vm1717_vm14 = vweird.f32 %v2528_v53  ;;  %2531 = vpow2.f32 %v2239_v40  ;;  %vm1493_vm15 = vmor %vm1491_vm9, %vm1492_vm12 }
 0x1b3   : > { %v1484_v26 = vsel %vm3992_vm5, %v1483_v20, %v1479_v25  ;;  %v1488_v33 = vsub.f32 1.0, %v1487_v36  ;;  %v1704_v31 = vsel %vm1703_vm13, %v2524_v51, %v1700_v14  ;;  %2533 = vpow2.f32 %v2225_v37  ;;  %vm1718_vm2 = vmor %vm1716_vm1, %vm1717_vm14  ;;  %v2629_v20 = vld [vmem:[%s2956_s16 + $0x20] sm:$0xff] }
 0x1b4   : > { %v1909_v46 = vmul.f32 %v1484_v26, %v3894_v44  ;;  %v2530_v44 = vpop.eup %2529  ;;  %v1713_v56 = vsub.f32 1.0, %v1712_v15  ;;  %v1709_v34 = vsel %vm4000_vm8, %v1708_v13, %v1704_v31  ;;  %v1723_v11 = vor.u32 1.1754944e-38, %v1722_v39  ;;  %v2630_v13 = vld [vmem:[%s2956_s16 + $0x98] sm:$0xff] }
 0x1b5   : > { %v1270_v60 = vpop.f32.mrf.mxu3  ;;  %v1235_v48 = vpop.f32.mrf.mxu1  ;;  %v1489_v42 = vmul.f32 %v2526_v28, %v1488_v33  ;;  %v4037_v10 = vadd.f32 1.0, %v2530_v44  ;;  %v1924_v54 = vmul.f32 %v1709_v34, %v3897_v5  ;;  %vm1721_vm3 = vcmp.eq.f32.partialorder %v1720_v57, 8.507059e+37 }
 0x1b6   : > { %v4029_v1 = vadd.f32 %v3866_v61, %v1270_v60  ;;  %v4032_v43 = vadd.f32 %v3866_v61, %v1235_v48  ;;  %v1941_v41 = vadd.f32 %v2627_v45, %v1909_v46  ;;  %v1714_v63 = vmul.f32 %v2528_v53, %v1713_v56  ;;  %v2633_v48 = vld [vmem:[%s2956_s16 + $0x30] sm:$0xff] }
 0x1b7   : > { %v1490_v30 = vadd.f32 %v2526_v28, %v1489_v42  ;;  %2535 = vrcp.f32 %v4037_v10  ;;  %v1956_v49 = vadd.f32 %v2628_v29, %v1924_v54  ;;  %vm1506_vm4 = vweird.f32 %v4037_v10  ;;  %v2634_v54 = vld [vmem:[%s2956_s16 + $0xa8] sm:$0xff] }
 0x1b8   : > { %v2240_v55 = vmul.f32 -1.442695, %v4029_v1  ;;  %1973 = vst [vmem:[%s3926_s27 + $0x18] sm:$0xff] %v1941_v41  ;;  %v2226_v62 = vmul.f32 -1.442695, %v4032_v43  ;;  %v1715_v47 = vadd.f32 %v2528_v53, %v1714_v63  ;;  %v2532_v5 = vpop.eup %2531 }
 0x1b9   : > { %v1494_v8 = vsel %vm1493_vm15, %v2526_v28, %v1490_v30  ;;  %1988 = vst [vmem:[%s3926_s27 + $0x90] sm:$0xff] %v1956_v49  ;;  %v4052_v6 = vadd.f32 1.0, %v2532_v5  ;;  %v2534_v9 = vpop.eup %2533  ;;  %v1510_v28 = vand.u32 2147483647, %v4037_v10 }
 0x1ba   : > { %2537 = vpow2.f32 %v2240_v55  ;;  %v1499_v23 = vsel %vm1496_vm0, %v1498_v19, %v1494_v8  ;;  %v1719_v59 = vsel %vm1718_vm2, %v2528_v53, %v1715_v47  ;;  %v4060_v21 = vadd.f32 1.0, %v2534_v9 }
 0x1bb   : > { %2539 = vpow2.f32 %v2226_v62  ;;  %v1910_v16 = vmul.f32 %v1499_v23, %v3930_v7  ;;  %v1724_v51 = vsel %vm1721_vm3, %v1723_v11, %v1719_v59  ;;  %v1735_v57 = vand.u32 2147483647, %v4052_v6 }
 0x1bc   : > { %v1925_v12 = vmul.f32 %v1724_v51, %v3933_v0  ;;  %2541 = vrcp.f32 %v4052_v6  ;;  %v1512_v0 = vand.u32 2147483648, %v4037_v10  ;;  %v1737_v36 = vand.u32 2147483648, %v4052_v6 }
 0x1bd   : > { %v1273_v52 = vpop.f32.mrf.mxu3  ;;  %v1238_v24 = vpop.f32.mrf.mxu1  ;;  %v1942_v22 = vadd.f32 %v2629_v20, %v1910_v16  ;;  %2543 = vrcp.f32 %v4060_v21  ;;  %v1525_v40 = vand.u32 2147483647, %v4060_v21  ;;  %v1527_v37 = vand.u32 2147483648, %v4060_v21 }
 0x1be   : > { %v4055_v27 = vadd.f32 %v3866_v61, %v1273_v52  ;;  %v2536_v7 = vpop.eup %2535  ;;  %v1957_v35 = vadd.f32 %v2630_v13, %v1925_v12  ;;  %v4075_v3 = vadd.f32 %v3866_v61, %v1238_v24  ;;  %vm4083_vm6 = vcmp.eq.f32.partialorder %v1510_v28, 8.507059e+37  ;;  %v2631_v52 = vld [vmem:[%s2956_s16 + $0x28] sm:$0xff] }
 0x1bf   : > { %1974 = vst [vmem:[%s3926_s27 + $0x20] sm:$0xff] %v1942_v22  ;;  %v1502_v17 = vmul.f32 %v2536_v7, %v4037_v10  ;;  %vm1507_vm5 = vweird.f32 %v2536_v7  ;;  %v1513_v33 = vor.u32 1.1754944e-38, %v1512_v0  ;;  %vm1731_vm7 = vweird.f32 %v4052_v6 }
 0x1c0   : > { %v2241_v4 = vmul.f32 -1.442695, %v4055_v27  ;;  %v2538_v38 = vpop.eup %2537  ;;  %1989 = vst [vmem:[%s3926_s27 + $0x98] sm:$0xff] %v1957_v35  ;;  %vm4089_vm8 = vcmp.eq.f32.partialorder %v1735_v57, 8.507059e+37  ;;  %v2227_v44 = vmul.f32 -1.442695, %v4075_v3  ;;  %vm1508_vm9 = vmor %vm1506_vm4, %vm1507_vm5  ;;  %vm1521_vm10 = vweird.f32 %v4060_v21 }
 0x1c1   : > { %v2540_v50 = vpop.eup %2539  ;;  %v1503_v32 = vsub.f32 1.0, %v1502_v17  ;;  %v4072_v25 = vadd.f32 1.0, %v2538_v38  ;;  %v1738_v31 = vor.u32 1.1754944e-38, %v1737_v36  ;;  %vm4101_vm12 = vcmp.eq.f32.partialorder %v1525_v40, 8.507059e+37  ;;  %v2632_v57 = vld [vmem:[%s2956_s16 + $0xa0] sm:$0xff] }
 0x1c2   : > { %v4078_v39 = vadd.f32 1.0, %v2540_v50  ;;  %2545 = vpow2.f32 %v2241_v4  ;;  %v2542_v53 = vpop.eup %2541  ;;  %v1528_v30 = vor.u32 1.1754944e-38, %v1527_v37 }
 0x1c3   : > { %v1504_v26 = vmul.f32 %v2536_v7, %v1503_v32  ;;  %2547 = vrcp.f32 %v4072_v25  ;;  %v1727_v15 = vmul.f32 %v2542_v53, %v4052_v6  ;;  %v2544_v45 = vpop.eup %2543  ;;  %v1750_v42 = vand.u32 2147483647, %v4072_v25 }
 0x1c4   : > { %2549 = vrcp.f32 %v4078_v39  ;;  %vm1732_vm11 = vweird.f32 %v2542_v53  ;;  %v1517_v55 = vmul.f32 %v2544_v45, %v4060_v21  ;;  %vm1746_vm13 = vweird.f32 %v4072_v25 }
 0x1c5   : > { %v1240_v46 = vpop.f32.mrf.mxu1  ;;  %v1505_v60 = vadd.f32 %v2536_v7, %v1504_v26  ;;  %v1728_v41 = vsub.f32 1.0, %v1727_v15  ;;  %v1275_v56 = vpop.f32.mrf.mxu3  ;;  %v1752_v19 = vand.u32 2147483648, %v4072_v25  ;;  %2551 = vpow2.f32 %v2227_v44  ;;  %vm1733_vm0 = vmor %vm1731_vm7, %vm1732_vm11 }
 0x1c6   : > { %v1518_v8 = vsub.f32 1.0, %v1517_v55  ;;  %vm4113_vm14 = vcmp.eq.f32.partialorder %v1750_v42, 8.507059e+37  ;;  %vm1536_vm15 = vweird.f32 %v4078_v39  ;;  %v4119_v16 = vadd.f32 %v3866_v61, %v1275_v56 }
 0x1c7   : > { %v1509_v34 = vsel %vm1508_vm9, %v2536_v7, %v1505_v60  ;;  %v1729_v62 = vmul.f32 %v2542_v53, %v1728_v41  ;;  %vm1522_vm1 = vweird.f32 %v2544_v45  ;;  %v1540_v22 = vand.u32 2147483647, %v4078_v39 }
 0x1c8   : > { %v2546_v63 = vpop.eup %2545  ;;  %v1514_v10 = vsel %vm4083_vm6, %v1513_v33, %v1509_v34  ;;  %v1519_v24 = vmul.f32 %v2544_v45, %v1518_v8  ;;  %v1542_v6 = vand.u32 2147483648, %v4078_v39  ;;  %vm1523_vm3 = vmor %vm1521_vm10, %vm1522_vm1  ;;  %v2242_v17 = vmul.f32 -1.442695, %v4119_v16 }
 0x1c9   : > { %v2548_v29 = vpop.eup %2547  ;;  %v1911_v49 = vmul.f32 %v1514_v10, %v3974_v58  ;;  %v4110_v47 = vadd.f32 1.0, %v2546_v63  ;;  %v1730_v5 = vadd.f32 %v2542_v53, %v1729_v62  ;;  %v1753_v0 = vor.u32 1.1754944e-38, %v1752_v19 }
 0x1ca   : > { %v1742_v23 = vmul.f32 %v2548_v29, %v4072_v25  ;;  %v2550_v59 = vpop.eup %2549  ;;  %v1520_v7 = vadd.f32 %v2544_v45, %v1519_v24  ;;  %vm1747_vm2 = vweird.f32 %v2548_v29  ;;  %v4137_v32 = vadd.f32 %v3866_v61, %v1240_v46 }
 0x1cb   : > { %v1943_v58 = vadd.f32 %v2631_v52, %v1911_v49  ;;  %2553 = vrcp.f32 %v4110_v47  ;;  %v1734_v9 = vsel %vm1733_vm0, %v2542_v53, %v1730_v5  ;;  %v1532_v20 = vmul.f32 %v2550_v59, %v4078_v39  ;;  %v2552_v50 = vpop.eup %2551  ;;  %vm1748_vm5 = vmor %vm1746_vm13, %vm1747_vm2  ;;  %v2635_v49 = vld [vmem:[%s2956_s16 + $0x38] sm:$0xff] }
 0x1cc   : > { %v1743_v51 = vsub.f32 1.0, %v1742_v23  ;;  %v1739_v12 = vsel %vm4089_vm8, %v1738_v31, %v1734_v9  ;;  %v1524_v28 = vsel %vm1523_vm3, %v2544_v45, %v1520_v7  ;;  %vm1537_vm4 = vweird.f32 %v2550_v59 }
 0x1cd   : > { %1975 = vst [vmem:[%s3926_s27 + $0x28] sm:$0xff] %v1943_v58  ;;  %v1926_v38 = vmul.f32 %v1739_v12, %v4008_v18  ;;  %v1533_v35 = vsub.f32 1.0, %v1532_v20  ;;  %v1529_v18 = vsel %vm4101_vm12, %v1528_v30, %v1524_v28  ;;  %v4146_v14 = vadd.f32 1.0, %v2552_v50  ;;  %vm1538_vm7 = vmor %vm1536_vm15, %vm1537_vm4 }
 0x1ce   : > { %v1744_v13 = vmul.f32 %v2548_v29, %v1743_v51  ;;  %v1912_v37 = vmul.f32 %v1529_v18, %v4015_v2  ;;  %2555 = vpow2.f32 %v2242_v17  ;;  %v2228_v46 = vmul.f32 -1.442695, %v4137_v32 }
 0x1cf   : > { %v1243_v4 = vpop.f32.mrf.mxu1  ;;  %v1958_v36 = vadd.f32 %v2632_v57, %v1926_v38  ;;  %v1534_v53 = vmul.f32 %v2550_v59, %v1533_v35  ;;  %vm1541_vm6 = vcmp.eq.f32.partialorder %v1540_v22, 8.507059e+37  ;;  %v1543_v25 = vor.u32 1.1754944e-38, %v1542_v6 }
 0x1d0   : > { %v1745_v21 = vadd.f32 %v2548_v29, %v1744_v13  ;;  %v1944_v44 = vadd.f32 %v2633_v48, %v1912_v37  ;;  %2557 = vrcp.f32 %v4146_v14  ;;  %v1767_v42 = vand.u32 2147483648, %v4110_v47  ;;  %v2636_v13 = vld [vmem:[%s2956_s16 + $0xb0] sm:$0xff] }
 0x1d1   : > { %v2554_v40 = vpop.eup %2553  ;;  %1990 = vst [vmem:[%s3926_s27 + $0xa0] sm:$0xff] %v1958_v36  ;;  %v1535_v15 = vadd.f32 %v2550_v59, %v1534_v53  ;;  %v1765_v34 = vand.u32 2147483647, %v4110_v47  ;;  %2559 = vpow2.f32 %v2228_v46  ;;  %vm1761_vm9 = vweird.f32 %v4110_v47 }
 0x1d2   : > { %v1278_v26 = vpop.f32.mrf.mxu3  ;;  %v1749_v33 = vsel %vm1748_vm5, %v2548_v29, %v1745_v21  ;;  %v1757_v60 = vmul.f32 %v2554_v40, %v4110_v47  ;;  %1976 = vst [vmem:[%s3926_s27 + $0x30] sm:$0xff] %v1944_v44  ;;  %vm1762_vm8 = vweird.f32 %v2554_v40  ;;  %v4170_v19 = vadd.f32 %v3866_v61, %v1243_v4 }
 0x1d3   : > { %v1754_v2 = vsel %vm4113_vm14, %v1753_v0, %v1749_v33  ;;  %v1539_v41 = vsel %vm1538_vm7, %v2550_v59, %v1535_v15  ;;  %v4163_v55 = vadd.f32 %v3866_v61, %v1278_v26  ;;  %v1768_v23 = vor.u32 1.1754944e-38, %v1767_v42  ;;  %vm1763_vm10 = vmor %vm1761_vm9, %vm1762_vm8 }
 0x1d4   : > { %v1927_v45 = vmul.f32 %v1754_v2, %v4029_v1  ;;  %v1758_v31 = vsub.f32 1.0, %v1757_v60  ;;  %v1544_v56 = vsel %vm1541_vm6, %v1543_v25, %v1539_v41  ;;  %v2556_v10 = vpop.eup %2555  ;;  %v2229_v47 = vmul.f32 -1.442695, %v4170_v19 }
 0x1d5   : > { %v1913_v63 = vmul.f32 %v1544_v56, %v4032_v43  ;;  %v2243_v62 = vmul.f32 -1.442695, %v4163_v55  ;;  %v4177_v43 = vadd.f32 1.0, %v2556_v10  ;;  %vm1766_vm11 = vcmp.eq.f32.partialorder %v1765_v34, 8.507059e+37 }
 0x1d6   : > { %v1959_v30 = vadd.f32 %v2634_v54, %v1927_v45  ;;  %v1759_v1 = vmul.f32 %v2554_v40, %v1758_v31  ;;  %v2558_v59 = vpop.eup %2557  ;;  %v1555_v22 = vand.u32 2147483647, %v4146_v14  ;;  %v1557_v4 = vand.u32 2147483648, %v4146_v14 }
 0x1d7   : > { %v1245_v39 = vpop.f32.mrf.mxu1  ;;  %v1945_v8 = vadd.f32 %v2635_v49, %v1913_v63  ;;  %2561 = vpow2.f32 %v2243_v62  ;;  %v1547_v9 = vmul.f32 %v2558_v59, %v4146_v14  ;;  %v2560_v51 = vpop.eup %2559  ;;  %vm1552_vm12 = vweird.f32 %v2558_v59 }
 0x1d8   : > { %v4173_v29 = vadd.f32 %v3866_v61, %v1245_v39  ;;  %1991 = vst [vmem:[%s3926_s27 + $0xa8] sm:$0xff] %v1959_v30  ;;  %v1760_v5 = vadd.f32 %v2554_v40, %v1759_v1  ;;  %2563 = vrcp.f32 %v4177_v43  ;;  %v4189_v6 = vadd.f32 1.0, %v2560_v51  ;;  %v2637_v39 = vld [vmem:[%s2956_s16 + $0x40] sm:$0xff] }
 0x1d9   : > { %1977 = vst [vmem:[%s3926_s27 + $0x38] sm:$0xff] %v1945_v8  ;;  %v1548_v7 = vsub.f32 1.0, %v1547_v9  ;;  %2565 = vpow2.f32 %v2229_v47  ;;  %v1780_v50 = vand.u32 2147483647, %v4177_v43  ;;  %vm1551_vm13 = vweird.f32 %v4146_v14 }
 0x1da   : > { %v1280_v11 = vpop.f32.mrf.mxu3  ;;  %v2230_v58 = vmul.f32 -1.442695, %v4173_v29  ;;  %v1764_v24 = vsel %vm1763_vm10, %v2554_v40, %v1760_v5  ;;  %v1782_v57 = vand.u32 2147483648, %v4177_v43  ;;  %vm1553_vm14 = vmor %vm1551_vm13, %vm1552_vm12  ;;  %vm1556_vm15 = vcmp.eq.f32.partialorder %v1555_v22, 8.507059e+37 }
 0x1db   : > { %v4181_v52 = vadd.f32 %v3866_v61, %v1280_v11  ;;  %v1769_v20 = vsel %vm1766_vm11, %v1768_v23, %v1764_v24  ;;  %v1549_v17 = vmul.f32 %v2558_v59, %v1548_v7  ;;  %v1558_v21 = vor.u32 1.1754944e-38, %v1557_v4 }
 0x1dc   : > { %v1928_v12 = vmul.f32 %v1769_v20, %v4055_v27  ;;  %2567 = vpow2.f32 %v2230_v58  ;;  %vm1776_vm0 = vweird.f32 %v4177_v43  ;;  %vm4206_vm1 = vcmp.eq.f32.partialorder %v1780_v50, 8.507059e+37 }
 0x1dd   : > { %v2244_v38 = vmul.f32 -1.442695, %v4181_v52  ;;  %2569 = vrcp.f32 %v4189_v6  ;;  %v2562_v28 = vpop.eup %2561  ;;  %v1550_v0 = vadd.f32 %v2558_v59, %v1549_v17  ;;  %v1570_v14 = vand.u32 2147483647, %v4189_v6 }
 0x1de   : > { %v1960_v35 = vadd.f32 %v2636_v13, %v1928_v12  ;;  %v2564_v27 = vpop.eup %2563  ;;  %v4199_v36 = vadd.f32 1.0, %v2562_v28  ;;  %v1572_v48 = vand.u32 2147483648, %v4189_v6  ;;  %v1783_v45 = vor.u32 1.1754944e-38, %v1782_v57 }
 0x1df   : > { %2571 = vpow2.f32 %v2244_v38  ;;  %v1772_v53 = vmul.f32 %v2564_v27, %v4177_v43  ;;  %v2566_v40 = vpop.eup %2565  ;;  %v1554_v37 = vsel %vm1553_vm14, %v2558_v59, %v1550_v0  ;;  %vm1566_vm2 = vweird.f32 %v4189_v6 }
 0x1e0   : > { %1992 = vst [vmem:[%s3926_s27 + $0xb0] sm:$0xff] %v1960_v35  ;;  %2573 = vrcp.f32 %v4199_v36  ;;  %v1559_v15 = vsel %vm1556_vm15, %v1558_v21, %v1554_v37  ;;  %v4213_v44 = vadd.f32 1.0, %v2566_v40  ;;  %vm1777_vm3 = vweird.f32 %v2564_v27  ;;  %v2638_v35 = vld [vmem:[%s2956_s16 + $0xb8] sm:$0xff] }
 0x1e1   : > { %v1773_v60 = vsub.f32 1.0, %v1772_v53  ;;  %v1914_v25 = vmul.f32 %v1559_v15, %v4075_v3  ;;  %v1795_v34 = vand.u32 2147483647, %v4199_v36  ;;  %vm4222_vm4 = vcmp.eq.f32.partialorder %v1570_v14, 8.507059e+37  ;;  %vm1778_vm5 = vmor %vm1776_vm0, %vm1777_vm3 }
 0x1e2   : > { %v1283_v18 = vpop.f32.mrf.mxu3  ;;  %v2568_v33 = vpop.eup %2567  ;;  %v1797_v3 = vand.u32 2147483648, %v4199_v36  ;;  %2575 = vrcp.f32 %v4213_v44  ;;  %v1573_v10 = vor.u32 1.1754944e-38, %v1572_v48  ;;  %vm1791_vm7 = vweird.f32 %v4199_v36  ;;  %v2639_v48 = vld [vmem:[%s2956_s16 + $0x48] sm:$0xff] }
 0x1e3   : > { %v4204_v26 = vpop.f32.mrf.mxu1  ;;  %v2570_v2 = vpop.eup %2569  ;;  %v4217_v41 = vadd.f32 1.0, %v2568_v33  ;;  %v1774_v42 = vmul.f32 %v2564_v27, %v1773_v60  ;;  %v1946_v54 = vadd.f32 %v2637_v39, %v1914_v25  ;;  %v4238_v8 = vadd.f32 %v3866_v61, %v1283_v18 }
 0x1e4   : > { %v1562_v56 = vmul.f32 %v2570_v2, %v4189_v6  ;;  %vm1567_vm6 = vweird.f32 %v2570_v2  ;;  %vm4244_vm8 = vcmp.eq.f32.partialorder %v1795_v34, 8.507059e+37  ;;  %v1585_v43 = vand.u32 2147483647, %v4213_v44 }
 0x1e5   : > { %v2572_v31 = vpop.eup %2571  ;;  %v1775_v63 = vadd.f32 %v2564_v27, %v1774_v42  ;;  %1978 = vst [vmem:[%s3926_s27 + $0x40] sm:$0xff] %v1946_v54  ;;  %2577 = vrcp.f32 %v4217_v41  ;;  %v1798_v24 = vor.u32 1.1754944e-38, %v1797_v3  ;;  %v1587_v9 = vand.u32 2147483648, %v4213_v44  ;;  %vm1568_vm10 = vmor %vm1566_vm2, %vm1567_vm6  ;;  %v4310_v54 = vld [vmem:[%s4534_s4] ss:$0 sm:$0xff] }
 0x1e6   : > { %v1563_v1 = vsub.f32 1.0, %v1562_v56  ;;  %v4228_v62 = vadd.f32 1.0, %v2572_v31  ;;  %v4230_v49 = vpop.eup %2573  ;;  %vm1581_vm9 = vweird.f32 %v4213_v44  ;;  %v1600_v12 = vand.u32 2147483647, %v4217_v41 }
 0x1e7   : > { %v1779_v23 = vsel %vm1778_vm5, %v2564_v27, %v1775_v63  ;;  %v1787_v59 = vmul.f32 %v4230_v49, %v4199_v36  ;;  %vm1792_vm11 = vweird.f32 %v4230_v49  ;;  %v1602_v13 = vand.u32 2147483648, %v4217_v41 }
 0x1e8   : > { %v1564_v11 = vmul.f32 %v2570_v2, %v1563_v1  ;;  %v1784_v58 = vsel %vm4206_vm1, %v1783_v45, %v1779_v23  ;;  %2579 = vrcp.f32 %v4228_v62  ;;  %v2576_v4 = vpop.eup %2575  ;;  %v1810_v38 = vand.u32 2147483647, %v4228_v62  ;;  %vm1793_vm0 = vmor %vm1791_vm7, %vm1792_vm11  ;;  %v2641_v1 = vld [vmem:[%s2956_s16 + $0xc0] sm:$0xff] }
 0x1e9   : > { %v1929_v51 = vmul.f32 %v1784_v58, %v4119_v16  ;;  %v1788_v22 = vsub.f32 1.0, %v1787_v59  ;;  %v2245_v16 = vmul.f32 -1.442695, %v4238_v8  ;;  %v1577_v27 = vmul.f32 %v2576_v4, %v4213_v44 }
 0x1ea   : > { %v4240_v5 = vpop.f32.mrf.mxu3  ;;  %v1565_v20 = vadd.f32 %v2570_v2, %v1564_v11  ;;  %vm4266_vm12 = vcmp.eq.f32.partialorder %v1585_v43, 8.507059e+37  ;;  %vm1582_vm13 = vweird.f32 %v2576_v4  ;;  %v1588_v18 = vor.u32 1.1754944e-38, %v1587_v9 }
 0x1eb   : > { %v1250_v7 = vpop.f32.mrf.mxu1  ;;  %v1961_v17 = vadd.f32 %v2638_v35, %v1929_v51  ;;  %v1789_v28 = vmul.f32 %v4230_v49, %v1788_v22  ;;  %v4270_v6 = vpop.eup %2577  ;;  %v1812_v21 = vand.u32 2147483648, %v4228_v62  ;;  %vm1596_vm14 = vweird.f32 %v4217_v41  ;;  %vm1583_vm5 = vmor %vm1581_vm9, %vm1582_vm13 }
 0x1ec   : > { %v1569_v50 = vsel %vm1568_vm10, %v2570_v2, %v1565_v20  ;;  %v1578_v37 = vsub.f32 1.0, %v1577_v27  ;;  %vm1806_vm15 = vweird.f32 %v4228_v62  ;;  %v1592_v46 = vmul.f32 %v4270_v6, %v4217_v41 }
 0x1ed   : > { %v1574_v57 = vsel %vm4222_vm4, %v1573_v10, %v1569_v50  ;;  %1993 = vst [vmem:[%s3926_s27 + $0xb8] sm:$0xff] %v1961_v17  ;;  %v1790_v40 = vadd.f32 %v4230_v49, %v1789_v28  ;;  %vm1597_vm1 = vweird.f32 %v4270_v6  ;;  %vm4287_vm2 = vcmp.eq.f32.partialorder %v1600_v12, 8.507059e+37  ;;  %v2642_v12 = vld [vmem:[%s2956_s16 + $0x50] sm:$0xff]  ;;  %v2643_v50 = vld [vmem:[%s2956_s16 + $0x58] sm:$0xff] }
 0x1ee   : > { %v1915_v53 = vmul.f32 %v1574_v57, %v4137_v32  ;;  %v2580_v14 = vpop.eup %2579  ;;  %v1603_v32 = vor.u32 1.1754944e-38, %v1602_v13  ;;  %2581 = vpow2.f32 %v2245_v16  ;;  %v4293_v15 = vadd.f32 %v3866_v61, %v4204_v26  ;;  %vm1598_vm6 = vmor %vm1596_vm14, %vm1597_vm1 }
 0x1ef   : > { %v1794_v25 = vsel %vm1793_vm0, %v4230_v49, %v1790_v40  ;;  %v1579_v36 = vmul.f32 %v2576_v4, %v1578_v37  ;;  %v1802_v45 = vmul.f32 %v2580_v14, %v4228_v62  ;;  %vm4298_vm3 = vcmp.eq.f32.partialorder %v1810_v38, 8.507059e+37 }
 0x1f0   : > { %v1947_v2 = vadd.f32 %v2639_v48, %v1915_v53  ;;  %v1799_v42 = vsel %vm4244_vm8, %v1798_v24, %v1794_v25  ;;  %vm1807_vm4 = vweird.f32 %v2580_v14  ;;  %v1593_v56 = vsub.f32 1.0, %v1592_v46 }
 0x1f1   : > { %v2231_v61 = vmul.f32 -1.442695, %v4293_v15  ;;  %v1930_v26 = vmul.f32 %v1799_v42, %v4163_v55  ;;  %v1580_v34 = vadd.f32 %v2576_v4, %v1579_v36  ;;  %v1803_v39 = vsub.f32 1.0, %v1802_v45  ;;  %vm1808_vm7 = vmor %vm1806_vm15, %vm1807_vm4 }
 0x1f2   : > { %v1288_v60 = vpop.f32.mrf.mxu3  ;;  %1979 = vst [vmem:[%s3926_s27 + $0x48] sm:$0xff] %v1947_v2  ;;  %v4314_v30 = vadd.f32 %v4310_v54, %v4240_v5  ;;  %v1594_v3 = vmul.f32 %v4270_v6, %v1593_v56  ;;  %v4321_v55 = vadd.f32 %v4310_v54, %v1250_v7  ;;  %v1813_v20 = vor.u32 1.1754944e-38, %v1812_v21 }
 0x1f3   : > { %2583 = vpow2.f32 %v2231_v61  ;;  %v4324_v63 = vadd.f32 %v4310_v54, %v1288_v60  ;;  %v1962_v10 = vadd.f32 %v2641_v1, %v1930_v26  ;;  %v1584_v49 = vsel %vm1583_vm5, %v2576_v4, %v1580_v34  ;;  %v1253_v11 = vpop.f32.mrf.mxu1 }
 0x1f4   : > { %v1804_v23 = vmul.f32 %v2580_v14, %v1803_v39  ;;  %v2246_v5 = vmul.f32 -1.442695, %v4314_v30  ;;  %v2582_v59 = vpop.eup %2581  ;;  %v1589_v44 = vsel %vm4266_vm12, %v1588_v18, %v1584_v49  ;;  %v1595_v47 = vadd.f32 %v4270_v6, %v1594_v3 }
 0x1f5   : > { %v2232_v43 = vmul.f32 -1.442695, %v4321_v55  ;;  %v2247_v58 = vmul.f32 -1.442695, %v4324_v63  ;;  %1994 = vst [vmem:[%s3926_s27 + $0xc0] sm:$0xff] %v1962_v10  ;;  %v1916_v24 = vmul.f32 %v1589_v44, %v4170_v19  ;;  %v4339_v51 = vadd.f32 1.0, %v2582_v59 }
 0x1f6   : > { %v1805_v9 = vadd.f32 %v2580_v14, %v1804_v23  ;;  %2585 = vpow2.f32 %v2246_v5  ;;  %v1599_v22 = vsel %vm1598_vm6, %v4270_v6, %v1595_v47  ;;  %v4346_v19 = vadd.f32 %v4310_v54, %v1253_v11  ;;  %v2644_v6 = vld [vmem:[%s2956_s16 + $0xc8] sm:$0xff] }
 0x1f7   : > { %2587 = vpow2.f32 %v2232_v43  ;;  %v1948_v7 = vadd.f32 %v2642_v12, %v1916_v24  ;;  %v1604_v4 = vsel %vm4287_vm2, %v1603_v32, %v1599_v22  ;;  %v1825_v18 = vand.u32 2147483647, %v4339_v51 }
 0x1f8   : > { %v1809_v41 = vsel %vm1808_vm7, %v2580_v14, %v1805_v9  ;;  %2589 = vrcp.f32 %v4339_v51  ;;  %v1917_v13 = vmul.f32 %v1604_v4, %v4173_v29  ;;  %v2233_v27 = vmul.f32 -1.442695, %v4346_v19 }
 0x1f9   : > { %v2584_v38 = vpop.eup %2583  ;;  %v1814_v62 = vsel %vm4298_vm3, %v1813_v20, %v1809_v41  ;;  %1980 = vst [vmem:[%s3926_s27 + $0x50] sm:$0xff] %v1948_v7  ;;  %2591 = vpow2.f32 %v2247_v58  ;;  %v1827_v29 = vand.u32 2147483648, %v4339_v51  ;;  %vm1821_vm8 = vweird.f32 %v4339_v51 }
 0x1fa   : > { %v1290_v16 = vpop.f32.mrf.mxu3  ;;  %v1931_v35 = vmul.f32 %v1814_v62, %v4181_v52  ;;  %v4357_v17 = vadd.f32 1.0, %v2584_v38  ;;  %v1949_v28 = vadd.f32 %v2643_v50, %v1917_v13  ;;  %vm4376_vm9 = vcmp.eq.f32.partialorder %v1825_v18, 8.507059e+37 }
 0x1fb   : > { %v4372_v37 = vadd.f32 %v4310_v54, %v1290_v16  ;;  %v1255_v14 = vpop.f32.mrf.mxu1  ;;  %v1828_v60 = vor.u32 1.1754944e-38, %v1827_v29 }
 0x1fc   : > { %v2586_v0 = vpop.eup %2585  ;;  %v1963_v57 = vadd.f32 %v2644_v6, %v1931_v35  ;;  %2593 = vrcp.f32 %v4357_v17  ;;  %1981 = vst [vmem:[%s3926_s27 + $0x58] sm:$0xff] %v1949_v28  ;;  %v1615_v48 = vand.u32 2147483647, %v4357_v17  ;;  %vm1611_vm10 = vweird.f32 %v4357_v17  ;;  %v2645_v28 = vld [vmem:[%s2956_s16 + $0xd0] sm:$0xff] }
 0x1fd   : > { %v2588_v21 = vpop.eup %2587  ;;  %v4366_v52 = vadd.f32 1.0, %v2586_v0  ;;  %2595 = vpow2.f32 %v2233_v27  ;;  %v1617_v25 = vand.u32 2147483648, %v4357_v17  ;;  %v2248_v42 = vmul.f32 -1.442695, %v4372_v37 }
 0x1fe   : > { %v2590_v53 = vpop.eup %2589  ;;  %1995 = vst [vmem:[%s3926_s27 + $0xc8] sm:$0xff] %v1963_v57  ;;  %v4369_v40 = vadd.f32 1.0, %v2588_v21  ;;  %v4390_v56 = vadd.f32 %v4310_v54, %v1255_v14  ;;  %vm4394_vm12 = vcmp.eq.f32.partialorder %v1615_v48, 8.507059e+37 }
 0x1ff   : > { %v1817_v46 = vmul.f32 %v2590_v53, %v4339_v51  ;;  %v2592_v33 = vpop.eup %2591  ;;  %2597 = vrcp.f32 %v4366_v52  ;;  %v1842_v45 = vand.u32 2147483648, %v4366_v52  ;;  %vm1822_vm11 = vweird.f32 %v2590_v53 }
 0x200   : > { %2599 = vrcp.f32 %v4369_v40  ;;  %v4386_v31 = vadd.f32 1.0, %v2592_v33  ;;  %v1840_v39 = vand.u32 2147483647, %v4366_v52  ;;  %v1630_v10 = vand.u32 2147483647, %v4369_v40  ;;  %vm1823_vm13 = vmor %vm1821_vm8, %vm1822_vm11 }
 0x201   : > { %v1818_v2 = vsub.f32 1.0, %v1817_v46  ;;  %v1632_v49 = vand.u32 2147483648, %v4369_v40  ;;  %v1618_v11 = vor.u32 1.1754944e-38, %v1617_v25  ;;  %vm1836_vm14 = vweird.f32 %v4366_v52 }
 0x202   : > { %v2594_v36 = vpop.eup %2593  ;;  %v1293_v3 = vpop.f32.mrf.mxu3  ;;  %2601 = vrcp.f32 %v4386_v31  ;;  %v1843_v47 = vor.u32 1.1754944e-38, %v1842_v45  ;;  %vm1626_vm15 = vweird.f32 %v4369_v40  ;;  %vm4408_vm1 = vcmp.eq.f32.partialorder %v1840_v39, 8.507059e+37 }
 0x203   : > { %v2596_v61 = vpop.eup %2595  ;;  %v1819_v26 = vmul.f32 %v2590_v53, %v1818_v2  ;;  %v1607_v34 = vmul.f32 %v2594_v36, %v4357_v17  ;;  %2603 = vpow2.f32 %v2248_v42  ;;  %vm1612_vm0 = vweird.f32 %v2594_v36  ;;  %v2646_v2 = vld [vmem:[%s2956_s16 + $0x60] sm:$0xff] }
 0x204   : > { %v4401_v59 = vadd.f32 1.0, %v2596_v61  ;;  %vm4415_vm2 = vcmp.eq.f32.partialorder %v1630_v10, 8.507059e+37  ;;  %v1633_v7 = vor.u32 1.1754944e-38, %v1632_v49  ;;  %v1855_v41 = vand.u32 2147483647, %v4386_v31  ;;  %vm1613_vm4 = vmor %vm1611_vm10, %vm1612_vm0  ;;  %v2647_v49 = vld [vmem:[%s2956_s16 + $0xd8] sm:$0xff] }
 0x205   : > { %v1820_v23 = vadd.f32 %v2590_v53, %v1819_v26  ;;  %v1608_v5 = vsub.f32 1.0, %v1607_v34  ;;  %v2598_v44 = vpop.eup %2597  ;;  %vm1851_vm3 = vweird.f32 %v4386_v31  ;;  %v2234_v35 = vmul.f32 -1.442695, %v4390_v56 }
 0x206   : > { %v2600_v43 = vpop.eup %2599  ;;  %v1832_v9 = vmul.f32 %v2598_v44, %v4366_v52  ;;  %2605 = vrcp.f32 %v4401_v59  ;;  %vm1837_vm5 = vweird.f32 %v2598_v44  ;;  %v4427_v50 = vadd.f32 %v4310_v54, %v1293_v3 }
 0x207   : > { %v1824_v58 = vsel %vm1823_vm13, %v2590_v53, %v1820_v23  ;;  %v1609_v24 = vmul.f32 %v2594_v36, %v1608_v5  ;;  %v1622_v22 = vmul.f32 %v2600_v43, %v4369_v40  ;;  %vm1627_vm6 = vweird.f32 %v2600_v43  ;;  %vm1838_vm8 = vmor %vm1836_vm14, %vm1837_vm5 }
 0x208   : > { %v1829_v51 = vsel %vm4376_vm9, %v1828_v60, %v1824_v58  ;;  %v1833_v62 = vsub.f32 1.0, %v1832_v9  ;;  %v2602_v13 = vpop.eup %2601  ;;  %v1857_v29 = vand.u32 2147483648, %v4386_v31  ;;  %vm4436_vm7 = vcmp.eq.f32.partialorder %v1855_v41, 8.507059e+37  ;;  %vm1628_vm10 = vmor %vm1626_vm15, %vm1627_vm6 }
 0x209   : > { %v1932_v4 = vmul.f32 %v1829_v51, %v4238_v8  ;;  %v1610_v38 = vadd.f32 %v2594_v36, %v1609_v24  ;;  %v1623_v16 = vsub.f32 1.0, %v1622_v22  ;;  %v1847_v6 = vmul.f32 %v2602_v13, %v4386_v31  ;;  %v2604_v57 = vpop.eup %2603  ;;  %v2649_v51 = vld [vmem:[%s2956_s16 + $0xe0] sm:$0xff] }
 0x20a   : > { %v1834_v0 = vmul.f32 %v2598_v44, %v1833_v62  ;;  %v1295_v33 = vpop.f32.mrf.mxu3  ;;  %vm1852_vm9 = vweird.f32 %v2602_v13  ;;  %v4443_v60 = vadd.f32 1.0, %v2604_v57  ;;  %2607 = vpow2.f32 %v2234_v35  ;;  %v2650_v35 = vld [vmem:[%s2956_s16 + $0x70] sm:$0xff] }
 0x20b   : > { %v1964_v8 = vadd.f32 %v2645_v28, %v1932_v4  ;;  %v1614_v27 = vsel %vm1613_vm4, %v2594_v36, %v1610_v38  ;;  %v1624_v17 = vmul.f32 %v2600_v43, %v1623_v16  ;;  %v1848_v46 = vsub.f32 1.0, %v1847_v6  ;;  %vm1853_vm11 = vmor %vm1851_vm3, %vm1852_vm9 }
 0x20c   : > { %v1619_v18 = vsel %vm4394_vm12, %v1618_v11, %v1614_v27  ;;  %v1835_v53 = vadd.f32 %v2598_v44, %v1834_v0  ;;  %v2606_v48 = vpop.eup %2605  ;;  %v2249_v45 = vmul.f32 -1.442695, %v4427_v50  ;;  %v4454_v26 = vadd.f32 %v4310_v54, %v1295_v33 }
 0x20d   : > { %1996 = vst [vmem:[%s3926_s27 + $0xd0] sm:$0xff] %v1964_v8  ;;  %v1918_v21 = vmul.f32 %v1619_v18, %v4293_v15  ;;  %v1625_v32 = vadd.f32 %v2600_v43, %v1624_v17  ;;  %v1849_v36 = vmul.f32 %v2602_v13, %v1848_v46  ;;  %v1637_v61 = vmul.f32 %v2606_v48, %v4401_v59 }
 0x20e   : > { %v1839_v25 = vsel %vm1838_vm8, %v2598_v44, %v1835_v53  ;;  %2609 = vrcp.f32 %v4443_v60  ;;  %v1858_v1 = vor.u32 1.1754944e-38, %v1857_v29  ;;  %v1645_v10 = vand.u32 2147483647, %v4401_v59  ;;  %v2648_v44 = vld [vmem:[%s2956_s16 + $0x68] sm:$0xff] }
 0x20f   : > { %v1950_v15 = vadd.f32 %v2646_v2, %v1918_v21  ;;  %v1844_v52 = vsel %vm4408_vm1, %v1843_v47, %v1839_v25  ;;  %v1629_v42 = vsel %vm1628_vm10, %v2600_v43, %v1625_v32  ;;  %v1850_v39 = vadd.f32 %v2602_v13, %v1849_v36 }
 0x210   : > { %v1933_v34 = vmul.f32 %v1844_v52, %v4314_v30  ;;  %v1634_v40 = vsel %vm4415_vm2, %v1633_v7, %v1629_v42  ;;  %v1638_v54 = vsub.f32 1.0, %v1637_v61  ;;  %v1647_v5 = vand.u32 2147483648, %v4401_v59  ;;  %v2608_v11 = vpop.eup %2607 }
 0x211   : > { %1982 = vst [vmem:[%s3926_s27 + $0x60] sm:$0xff] %v1950_v15  ;;  %v1919_v3 = vmul.f32 %v1634_v40, %v4321_v55  ;;  %v1854_v23 = vsel %vm1853_vm11, %v2602_v13, %v1850_v39  ;;  %2611 = vpow2.f32 %v2249_v45  ;;  %vm1642_vm12 = vweird.f32 %v2606_v48 }
 0x212   : > { %v1965_v30 = vadd.f32 %v2647_v49, %v1933_v34  ;;  %v1859_v31 = vsel %vm4436_vm7, %v1858_v1, %v1854_v23  ;;  %v1639_v47 = vmul.f32 %v2606_v48, %v1638_v54  ;;  %v1409_v58 = vadd.f32 1.0, %v2608_v11  ;;  %v2652_v1 = vld [vmem:[%s2956_s16 + $0x78] sm:$0xff] }
 0x213   : > { %v1951_v55 = vadd.f32 %v2648_v44, %v1919_v3  ;;  %v1934_v43 = vmul.f32 %v1859_v31, %v4324_v63  ;;  %v2250_v24 = vmul.f32 -1.442695, %v4454_v26  ;;  %vm1641_vm13 = vweird.f32 %v4401_v59 }
 0x214   : > { %1997 = vst [vmem:[%s3926_s27 + $0xd8] sm:$0xff] %v1965_v30  ;;  %v1640_v9 = vadd.f32 %v2606_v48, %v1639_v47  ;;  %v2610_v20 = vpop.eup %2609  ;;  %vm1643_vm14 = vmor %vm1641_vm13, %vm1642_vm12  ;;  %v1648_v12 = vor.u32 1.1754944e-38, %v1647_v5  ;;  %2613 = vrcp.f32 %v1409_v58  ;;  %vm1646_vm15 = vcmp.eq.f32.partialorder %v1645_v10, 8.507059e+37 }
 0x215   : > { %1983 = vst [vmem:[%s3926_s27 + $0x68] sm:$0xff] %v1951_v55  ;;  %v1966_v22 = vadd.f32 %v2649_v51, %v1934_v43  ;;  %v1862_v41 = vmul.f32 %v2610_v20, %v4443_v60  ;;  %2615 = vpow2.f32 %v2250_v24  ;;  %v1870_v13 = vand.u32 2147483647, %v4443_v60  ;;  %v2653_v55 = vld [vmem:[%s2956_s16 + $0xf0] sm:$0xff] }
 0x216   : > { %v1644_v7 = vsel %vm1643_vm14, %v2606_v48, %v1640_v9  ;;  %v1872_v16 = vand.u32 2147483648, %v4443_v60  ;;  %vm1867_vm0 = vweird.f32 %v2610_v20  ;;  %vm1866_vm1 = vweird.f32 %v4443_v60  ;;  %v2651_v48 = vld [vmem:[%s2956_s16 + $0xe8] sm:$0xff]  ;;  %v2654_v9 = vld [vmem:[%s2956_s16 + $0xf8] sm:$0xff] }
 0x217   : > { %v2612_v63 = vpop.eup %2611  ;;  %1998 = vst [vmem:[%s3926_s27 + $0xe0] sm:$0xff] %v1966_v22  ;;  %v1649_v4 = vsel %vm1646_vm15, %v1648_v12, %v1644_v7  ;;  %v1863_v62 = vsub.f32 1.0, %v1862_v41  ;;  %vm1868_vm2 = vmor %vm1866_vm1, %vm1867_vm0  ;;  %vm1871_vm3 = vcmp.eq.f32.partialorder %v1870_v13, 8.507059e+37  ;;  %v1660_v53 = vand.u32 2147483647, %v1409_v58 }
 0x218   : > { %v1920_v38 = vmul.f32 %v1649_v4, %v4346_v19  ;;  %v1424_v59 = vadd.f32 1.0, %v2612_v63  ;;  %v1873_v19 = vor.u32 1.1754944e-38, %v1872_v16  ;;  %v1662_v46 = vand.u32 2147483648, %v1409_v58 }
 0x219   : > { %v1864_v8 = vmul.f32 %v2610_v20, %v1863_v62  ;;  %vm1656_vm5 = vweird.f32 %v1409_v58  ;;  %vm1661_vm7 = vcmp.eq.f32.partialorder %v1660_v53, 8.507059e+37 }
 0x21a   : > { %v1952_v28 = vadd.f32 %v2650_v35, %v1920_v38  ;;  %2617 = vrcp.f32 %v1424_v59  ;;  %v2614_v27 = vpop.eup %2613  ;;  %v1663_v25 = vor.u32 1.1754944e-38, %v1662_v46  ;;  %v1887_v52 = vand.u32 2147483648, %v1424_v59 }
 0x21b   : > { %v1865_v0 = vadd.f32 %v2610_v20, %v1864_v8  ;;  %v1652_v6 = vmul.f32 %v2614_v27, %v1409_v58  ;;  %v2616_v57 = vpop.eup %2615  ;;  %vm1657_vm4 = vweird.f32 %v2614_v27  ;;  %vm1881_vm9 = vweird.f32 %v1424_v59 }
 0x21c   : > { %1984 = vst [vmem:[%s3926_s27 + $0x70] sm:$0xff] %v1952_v28  ;;  %v1425_v29 = vadd.f32 1.0, %v2616_v57  ;;  %vm1658_vm6 = vmor %vm1656_vm5, %vm1657_vm4  ;;  %v1888_v10 = vor.u32 1.1754944e-38, %v1887_v52 }
 0x21d   : > { %v1869_v18 = vsel %vm1868_vm2, %v2610_v20, %v1865_v0  ;;  %v1653_v17 = vsub.f32 1.0, %v1652_v6 }
 0x21e   : > { %v1874_v21 = vsel %vm1871_vm3, %v1873_v19, %v1869_v18  ;;  %2619 = vrcp.f32 %v1425_v29  ;;  %v1902_v5 = vand.u32 2147483648, %v1425_v29  ;;  %v1900_v44 = vand.u32 2147483647, %v1425_v29 }
 0x21f   : > { %v1935_v33 = vmul.f32 %v1874_v21, %v4372_v37  ;;  %v1654_v32 = vmul.f32 %v2614_v27, %v1653_v17  ;;  %v1885_v37 = vand.u32 2147483647, %v1424_v59  ;;  %vm1896_vm13 = vweird.f32 %v1425_v29 }
 0x220   : > { %v2618_v14 = vpop.eup %2617  ;;  %v1903_v43 = vor.u32 1.1754944e-38, %v1902_v5  ;;  %vm1901_vm15 = vcmp.eq.f32.partialorder %v1900_v44, 8.507059e+37 }
 0x221   : > { %v1877_v60 = vmul.f32 %v2618_v14, %v1424_v59  ;;  %v1967_v2 = vadd.f32 %v2651_v48, %v1935_v33  ;;  %v1655_v15 = vadd.f32 %v2614_v27, %v1654_v32  ;;  %vm1882_vm8 = vweird.f32 %v2618_v14 }
 0x222   : > { %vm1883_vm10 = vmor %vm1881_vm9, %vm1882_vm8  ;;  %vm1886_vm11 = vcmp.eq.f32.partialorder %v1885_v37, 8.507059e+37 }
 0x223   : > { %v1878_v36 = vsub.f32 1.0, %v1877_v60  ;;  %1999 = vst [vmem:[%s3926_s27 + $0xe8] sm:$0xff] %v1967_v2  ;;  %v1659_v45 = vsel %vm1658_vm6, %v2614_v27, %v1655_v15 }
 0x224   : > { %v1664_v42 = vsel %vm1661_vm7, %v1663_v25, %v1659_v45  ;;  %v2620_v34 = vpop.eup %2619 }
 0x225   : > { %v1879_v61 = vmul.f32 %v2618_v14, %v1878_v36  ;;  %v1921_v40 = vmul.f32 %v1664_v42, %v4390_v56  ;;  %v1892_v3 = vmul.f32 %v2620_v34, %v1425_v29  ;;  %vm1897_vm12 = vweird.f32 %v2620_v34 }
 0x226   : > { %vm1898_vm14 = vmor %vm1896_vm13, %vm1897_vm12 }
 0x227   : > { %v1880_v39 = vadd.f32 %v2618_v14, %v1879_v61  ;;  %v1953_v54 = vadd.f32 %v2652_v1, %v1921_v40  ;;  %v1893_v30 = vsub.f32 1.0, %v1892_v3 }
 0x229   : > { %v1884_v49 = vsel %vm1883_vm10, %v2618_v14, %v1880_v39  ;;  %1985 = vst [vmem:[%s3926_s27 + $0x78] sm:$0xff] %v1953_v54  ;;  %v1894_v56 = vmul.f32 %v2620_v34, %v1893_v30 }
 0x22a   : > { %v1889_v23 = vsel %vm1886_vm11, %v1888_v10, %v1884_v49 }
 0x22b   : > { %v1936_v11 = vmul.f32 %v1889_v23, %v4427_v50  ;;  %v1895_v47 = vadd.f32 %v2620_v34, %v1894_v56 }
 0x22d   : > { %v1968_v31 = vadd.f32 %v2653_v55, %v1936_v11  ;;  %v1899_v58 = vsel %vm1898_vm14, %v2620_v34, %v1895_v47 }
 0x22e   : > { %v1904_v50 = vsel %vm1901_vm15, %v1903_v43, %v1899_v58 }
 0x22f   : > { %2000 = vst [vmem:[%s3926_s27 + $0xf0] sm:$0xff] %v1968_v31  ;;  %v1937_v24 = vmul.f32 %v1904_v50, %v4454_v26 }
 0x231   : > { %v1969_v20 = vadd.f32 %v2654_v9, %v1937_v24 }
 0x233   : > { %2001 = vst [vmem:[%s3926_s27 + $0xf8] sm:$0xff] %v1969_v20 }
 0x234   : > { %2772 = shalt.err (!%p2769_p10)
}
 0x235   : > { %s2823_s8 = smov 128   ;;  %s2824_s16 = smov 8  }
 0x236   : > { %2300 = dma.vmem_to_hbm [thread:$0]  (%p2920_p0), %s2016_s22, 4096, %s2018_s15, %s2003_s24, %s2823_s8, %s2823_s8, %s2824_s16  }
 0x237 PF: > { %p2322_p11 = scmp.ge.s32.totalorder %s2815_s21, 2  ;;  %s2032_s27 = sand.u32 1, %s2803_s18  }
 0x238   : > { %s2033_s6 = scalar_lea.sflag [#allocation4], %s2032_s27 }
 0x239   : > { %p2314_p12 = pnand %p2322_p11, %p2890_p6 }
 0x23b   : > { %p2315_p13 = pneg %p2314_p12 }
 0x23d   : > { %2798 = dma.done.wait (%p2315_p13), %s2033_s6, 4096  }
 0x23e   : > { %2800 = vsyncadd (%p2315_p13), %s2033_s6, 4294963200  ;;  %p19_p3 = scmp.ge.s32.totalorder %s2910_s14, 6   ;;  %s4663_s18 = smov %s2807_s19 }
 0x23f   : > { %s4664_s19 = smov %s2811_s20  ;;  %s4665_s20 = smov %s2926_s23 }
 0x240   : > { %s4666_s21 = smov %s2910_s14  ;;  %21 = sbr.rel (!%p19_p3) target bundleno = 6 (0x6), region = 93 }
 0x245   :  { %2039 = vsyncpa [#allocation3], 1 }
 0x246   :  { %2041 = vsyncpa [#allocation3 + $0x1], 1 }
 0x247   :  { %2042 = vsyncpa [#allocation6], 1 }
 0x248   :  { %2043 = vsyncpa [#allocation4], 1 }
 0x249   :  { %2045 = vsyncpa [#allocation4 + $0x1], 1 }

</bundles_post_ra>
